<compile_context>
chip_gen: v6e
topology: v6e:2x2x1
jax: 0.10.0
libtpu: 0.0.40
codegen_flags: <defaults>
</compile_context>

<pallas_src>
import functools
import math

import jax
import jax.numpy as jnp
import numpy as np
from jax.experimental import pallas as pl
from jax.experimental.pallas import tpu as pltpu


def _channel_attention_gg_kernel(
    x_ref, fc1_ref, fc2_ref, o_ref, *, n_h, n_h_in, n_in, n_out, c_mid, inv_hw
):
    lane_c = n_out * n_h_in  # compact lane pattern: lane = o * n_h_in + h (h fastest)

    # ---- adaptive avg / max pooling over the spatial (lane) axis ----
    x = x_ref[...]                                   # (n_in, n_h_in, H*W) f32
    p_sum = jnp.sum(x, axis=-1) * inv_hw             # (n_in, n_h_in)  mean[c, h]
    p_max = jnp.max(x, axis=-1)                      # (n_in, n_h_in)  max[c, h]

    # ---- tile pooled[c, h] to the compact (o, h) lane pattern ----
    lane_h = jax.lax.broadcasted_iota(jnp.int32, (n_in, lane_c), 1)
    if (n_h_in & (n_h_in - 1)) == 0:
        lane_h = lane_h & (n_h_in - 1)
    else:
        lane_h = lane_h % n_h_in
    pm = jnp.zeros((n_in, lane_c), jnp.float32)
    px = jnp.zeros((n_in, lane_c), jnp.float32)
    for h in range(n_h_in):
        pm = jnp.where(lane_h == h, p_sum[:, h:h + 1], pm)   # mean[c, h(lane)]
        px = jnp.where(lane_h == h, p_max[:, h:h + 1], px)   # max[c, h(lane)]

    # ---- per rolled-group element g: two grouped linear layers (pure vreg FMAs) ----
    for g in range(n_h):
        # layer 1: hidden[d, (o,h)] = sum_c pooled[c, h] * w1[o, d, c, (h-g) % n_h_in]
        hm = jnp.zeros((c_mid, lane_c), jnp.float32)
        hx = jnp.zeros((c_mid, lane_c), jnp.float32)
        for c in range(n_in):
            w1 = fc1_ref[g, c]                       # (c_mid, lane_c)
            hm = hm + pm[c:c + 1, :] * w1
            hx = hx + px[c:c + 1, :] * w1
        # fc2 is linear and shared by both branches -> add the relu'd hiddens first.
        hsum = jnp.maximum(hm, 0.0) + jnp.maximum(hx, 0.0)   # (c_mid, lane_c)

        # layer 2: logits[c_out, (o,h)] = sum_d hsum[d, (o,h)] * w2[o, c_out, d, (h-g) % n_h_in]
        logits = jnp.zeros((n_in, lane_c), jnp.float32)
        for d in range(c_mid):
            logits = logits + hsum[d:d + 1, :] * fc2_ref[g, d]   # (1,L)*(n_in,L)

        # numerically stable sigmoid: exp on EUP, exact divide
        z = jnp.exp(-jnp.abs(logits))
        o_ref[g] = jnp.where(logits >= 0.0, 1.0 / (1.0 + z), z / (1.0 + z))


def left_action_of_h_grid(w, n_h):
    # torch.stack([w.roll(shifts=i, dims=-1) for i in range(n_h)], dim=1)
    return jnp.stack([jnp.roll(w, shift=i, axis=-1) for i in range(n_h)], axis=1)


def make_channel_attention_gg(weight_fc1, weight_fc2, n_h):
    """One-time weight re-layout at init; returns a jitted forward(x)."""
    n_out, c_mid, n_in, n_h_in = weight_fc1.shape
    lane_c = n_out * n_h_in

    # --- init-time weight prep (NOT in the per-forward path) ---
    fc1_r = left_action_of_h_grid(weight_fc1.astype(jnp.float32), n_h)  # (o, g, d, c, h)
    fc2_r = left_action_of_h_grid(weight_fc2.astype(jnp.float32), n_h)  # (o, g, c, d, h)
    # fc1_c[g, c, d, o*n_h_in + h] = w1[o, d, c, (h-g) % n_h_in]   (compact: 32 lanes)
    fc1_c = jnp.transpose(fc1_r, (1, 3, 2, 0, 4)).reshape(n_h, n_in, c_mid, lane_c)
    # fc2_c[g, d, c_out, o*n_h_in + h] = w2[o, c_out, d, (h-g) % n_h_in]
    fc2_c = jnp.transpose(fc2_r, (1, 3, 2, 0, 4)).reshape(n_h, c_mid, n_in, lane_c)

    @jax.jit
    def forward(x):
        b, nc, nh_in, hh, ww = x.shape
        assert b == 1, "module broadcast semantics require batch == 1"
        assert nc == n_in and nh_in == n_h_in
        hw = hh * ww
        # natural row order -> only a (free) reshape, no transpose op in the wrapper
        x3 = x.reshape(n_in, n_h_in, hw).astype(jnp.float32)

        kernel = functools.partial(
            _channel_attention_gg_kernel,
            n_h=n_h, n_h_in=n_h_in, n_in=n_in, n_out=n_out, c_mid=c_mid,
            inv_hw=1.0 / float(hw),
        )
        flops = (2 * n_in * n_h_in * hw
                 + n_h * n_in * 4 * c_mid * lane_c
                 + n_h * c_mid * 2 * n_in * lane_c)
        bytes_accessed = 4 * (n_in * n_h_in * hw + fc1_c.size + fc2_c.size
                              + n_h * n_in * lane_c)

        out = pl.pallas_call(
            kernel,
            out_shape=jax.ShapeDtypeStruct((n_h, n_in, lane_c), jnp.float32),
            grid=(1,),  # whole problem (~100 KiB) is VMEM-resident
            in_specs=[
                pl.BlockSpec((n_in, n_h_in, hw), lambda i: (0, 0, 0)),
                pl.BlockSpec((n_h, n_in, c_mid, lane_c), lambda i: (0, 0, 0, 0)),
                pl.BlockSpec((n_h, c_mid, n_in, lane_c), lambda i: (0, 0, 0, 0)),
            ],
            out_specs=pl.BlockSpec((n_h, n_in, lane_c), lambda i: (0, 0, 0)),
            compiler_params=pltpu.CompilerParams(dimension_semantics=("arbitrary",)),
            cost_estimate=pl.CostEstimate(
                flops=int(flops),
                transcendentals=int(n_h * n_in * lane_c),
                bytes_accessed=int(bytes_accessed)),
        )(x3, fc1_c, fc2_c)

        # kernel out[g, c_out, (o, h)] -> (1, N_out, N_h, N_in, N_h_in, 1, 1)
        out = out.reshape(n_h, n_in, n_out, n_h_in)
        out = jnp.transpose(out, (2, 0, 1, 3))
        return out.reshape(1, n_out, n_h, n_in, n_h_in, 1, 1)

    return forward


# ----------------------- pure-JAX reference (mirrors the torch code) -----------------------
def _reference(x, weight_fc1, weight_fc2, n_h):
    fc1 = left_action_of_h_grid(weight_fc1, n_h)
    fc2 = left_action_of_h_grid(weight_fc2, n_h)

    def lin(inp, w):
        in_r = jnp.expand_dims(inp, -4)
        w_r = w.reshape((1,) + w.shape + (1,))
        return (in_r * w_r).sum(-3)

    input_mean = x.mean(axis=(-2, -1))[..., None]
    input_max = x.max(axis=(-2, -1))[..., None]
    avg_out = lin(jax.nn.relu(lin(input_mean, fc1)), fc2)
    max_out = lin(jax.nn.relu(lin(input_max, fc1)), fc2)
    out = jax.nn.sigmoid(avg_out + max_out)
    return out.reshape(x.shape[0], weight_fc1.shape[0], n_h, -1, weight_fc1.shape[-1], 1, 1)


def _kaiming_uniform(key, shape):
    # torch.nn.init.kaiming_uniform_(w, a=sqrt(5)) -> bound = 1/sqrt(fan_in)
    fan_in = int(np.prod(shape[1:]))
    bound = 1.0 / math.sqrt(fan_in)
    return jax.random.uniform(key, shape, jnp.float32, minval=-bound, maxval=bound)


if __name__ == "__main__":
    # Module hyper-params (ratio=1 as in the default).
    N_h, N_out, N_h_in, N_in, ratio = 4, 8, 4, 8, 1
    C_mid = N_in // ratio
    B, H, W = 1, 16, 16  # B must be 1 (module broadcast semantics)

    key = jax.random.PRNGKey(0)
    k1, k2, k3 = jax.random.split(key, 3)
    weight_fc1 = _kaiming_uniform(k1, (N_out, C_mid, N_in, N_h_in))
    weight_fc2 = _kaiming_uniform(k2, (N_out, N_in, C_mid, N_h_in))
    x = jax.random.normal(k3, (B, N_in, N_h_in, H, W), jnp.float32)

    forward = make_channel_attention_gg(weight_fc1, weight_fc2, N_h)  # weight prep once
    out = jax.block_until_ready(forward(x))

    ref = _reference(x, weight_fc1, weight_fc2, N_h)
    assert out.shape == (B, N_out, N_h, N_in, N_h_in, 1, 1), out.shape
    np.testing.assert_allclose(np.asarray(out), np.asarray(ref), rtol=1e-5, atol=1e-5)
    print("KERNEL_OK")
</pallas_src>

<mosaic_0001>
module attributes {stable_mosaic.version = 11 : i64} {
  func.func @_channel_attention_gg_kernel(%arg0: i32, %arg1: memref<8x4x256xf32, #tpu.memory_space<vmem>>, %arg2: memref<4x8x8x32xf32, #tpu.memory_space<vmem>>, %arg3: memref<4x8x8x32xf32, #tpu.memory_space<vmem>>, %arg4: memref<4x8x32xf32, #tpu.memory_space<vmem>>) attributes {dimension_semantics = [#tpu.dimension_semantics<arbitrary>], iteration_bounds = array<i64: 1>, scalar_prefetch = 0 : i64, scratch_operands = 0 : i64, tpu.core_type = #tpu.core_type<tc>, window_params = [{pipeline_mode = #tpu.pipeline_mode<synchronous>, transform_indices = @transform_0, window_bounds = array<i64: 8, 4, 256>}, {pipeline_mode = #tpu.pipeline_mode<synchronous>, transform_indices = @transform_1, window_bounds = array<i64: 4, 8, 8, 32>}, {pipeline_mode = #tpu.pipeline_mode<synchronous>, transform_indices = @transform_2, window_bounds = array<i64: 4, 8, 8, 32>}, {pipeline_mode = #tpu.pipeline_mode<synchronous>, transform_indices = @transform_3, window_bounds = array<i64: 4, 8, 32>}]} {
    %c0 = arith.constant 0 : index
    %c0_0 = arith.constant 0 : index
    %c0_1 = arith.constant 0 : index
    %0 = vector.load %arg1[%c0, %c0_0, %c0_1] : memref<8x4x256xf32, #tpu.memory_space<vmem>>, vector<8x4x256xf32>
    %cst = arith.constant dense<0.000000e+00> : vector<8x4xf32>
    %1 = vector.multi_reduction <add>, %0, %cst [2] : vector<8x4x256xf32> to vector<8x4xf32>
    %cst_2 = arith.constant 3.906250e-03 : f32
    %2 = vector.broadcast %cst_2 : f32 to vector<8x4xf32>
    %3 = arith.mulf %1, %2 : vector<8x4xf32>
    %cst_3 = arith.constant dense<0xFF800000> : vector<8x4xf32>
    %4 = vector.multi_reduction <maximumf>, %0, %cst_3 [2] : vector<8x4x256xf32> to vector<8x4xf32>
    %5 = tpu.iota {dimensions = array<i32: 1>} : vector<8x32xi32>
    %c3_i32 = arith.constant 3 : i32
    %6 = vector.broadcast %c3_i32 : i32 to vector<8x32xi32>
    %7 = arith.andi %5, %6 : vector<8x32xi32>
    %cst_4 = arith.constant 0.000000e+00 : f32
    %8 = vector.broadcast %cst_4 : f32 to vector<8x32xf32>
    %cst_5 = arith.constant 0.000000e+00 : f32
    %9 = vector.broadcast %cst_5 : f32 to vector<8x32xf32>
    %c0_i32 = arith.constant 0 : i32
    %10 = vector.broadcast %c0_i32 : i32 to vector<8x32xi32>
    %11 = arith.cmpi eq, %7, %10 : vector<8x32xi32>
    %12 = vector.extract_strided_slice %3 {offsets = [0, 0], sizes = [8, 1], strides = [1, 1]} : vector<8x4xf32> to vector<8x1xf32>
    %13 = vector.shape_cast %12 : vector<8x1xf32> to vector<8x1xf32>
    %14 = vector.broadcast %13 : vector<8x1xf32> to vector<8x32xf32>
    %15 = arith.select %11, %14, %8 : vector<8x32xi1>, vector<8x32xf32>
    %c0_i32_6 = arith.constant 0 : i32
    %16 = vector.broadcast %c0_i32_6 : i32 to vector<8x32xi32>
    %17 = arith.cmpi eq, %7, %16 : vector<8x32xi32>
    %18 = vector.extract_strided_slice %4 {offsets = [0, 0], sizes = [8, 1], strides = [1, 1]} : vector<8x4xf32> to vector<8x1xf32>
    %19 = vector.shape_cast %18 : vector<8x1xf32> to vector<8x1xf32>
    %20 = vector.broadcast %19 : vector<8x1xf32> to vector<8x32xf32>
    %21 = arith.select %17, %20, %9 : vector<8x32xi1>, vector<8x32xf32>
    %c1_i32 = arith.constant 1 : i32
    %22 = vector.broadcast %c1_i32 : i32 to vector<8x32xi32>
    %23 = arith.cmpi eq, %7, %22 : vector<8x32xi32>
    %24 = vector.extract_strided_slice %3 {offsets = [0, 1], sizes = [8, 1], strides = [1, 1]} : vector<8x4xf32> to vector<8x1xf32>
    %25 = vector.shape_cast %24 : vector<8x1xf32> to vector<8x1xf32>
    %26 = vector.broadcast %25 : vector<8x1xf32> to vector<8x32xf32>
    %27 = arith.select %23, %26, %15 : vector<8x32xi1>, vector<8x32xf32>
    %c1_i32_7 = arith.constant 1 : i32
    %28 = vector.broadcast %c1_i32_7 : i32 to vector<8x32xi32>
    %29 = arith.cmpi eq, %7, %28 : vector<8x32xi32>
    %30 = vector.extract_strided_slice %4 {offsets = [0, 1], sizes = [8, 1], strides = [1, 1]} : vector<8x4xf32> to vector<8x1xf32>
    %31 = vector.shape_cast %30 : vector<8x1xf32> to vector<8x1xf32>
    %32 = vector.broadcast %31 : vector<8x1xf32> to vector<8x32xf32>
    %33 = arith.select %29, %32, %21 : vector<8x32xi1>, vector<8x32xf32>
    %c2_i32 = arith.constant 2 : i32
    %34 = vector.broadcast %c2_i32 : i32 to vector<8x32xi32>
    %35 = arith.cmpi eq, %7, %34 : vector<8x32xi32>
    %36 = vector.extract_strided_slice %3 {offsets = [0, 2], sizes = [8, 1], strides = [1, 1]} : vector<8x4xf32> to vector<8x1xf32>
    %37 = vector.shape_cast %36 : vector<8x1xf32> to vector<8x1xf32>
    %38 = vector.broadcast %37 : vector<8x1xf32> to vector<8x32xf32>
    %39 = arith.select %35, %38, %27 : vector<8x32xi1>, vector<8x32xf32>
    %c2_i32_8 = arith.constant 2 : i32
    %40 = vector.broadcast %c2_i32_8 : i32 to vector<8x32xi32>
    %41 = arith.cmpi eq, %7, %40 : vector<8x32xi32>
    %42 = vector.extract_strided_slice %4 {offsets = [0, 2], sizes = [8, 1], strides = [1, 1]} : vector<8x4xf32> to vector<8x1xf32>
    %43 = vector.shape_cast %42 : vector<8x1xf32> to vector<8x1xf32>
    %44 = vector.broadcast %43 : vector<8x1xf32> to vector<8x32xf32>
    %45 = arith.select %41, %44, %33 : vector<8x32xi1>, vector<8x32xf32>
    %c3_i32_9 = arith.constant 3 : i32
    %46 = vector.broadcast %c3_i32_9 : i32 to vector<8x32xi32>
    %47 = arith.cmpi eq, %7, %46 : vector<8x32xi32>
    %48 = vector.extract_strided_slice %3 {offsets = [0, 3], sizes = [8, 1], strides = [1, 1]} : vector<8x4xf32> to vector<8x1xf32>
    %49 = vector.shape_cast %48 : vector<8x1xf32> to vector<8x1xf32>
    %50 = vector.broadcast %49 : vector<8x1xf32> to vector<8x32xf32>
    %51 = arith.select %47, %50, %39 : vector<8x32xi1>, vector<8x32xf32>
    %c3_i32_10 = arith.constant 3 : i32
    %52 = vector.broadcast %c3_i32_10 : i32 to vector<8x32xi32>
    %53 = arith.cmpi eq, %7, %52 : vector<8x32xi32>
    %54 = vector.extract_strided_slice %4 {offsets = [0, 3], sizes = [8, 1], strides = [1, 1]} : vector<8x4xf32> to vector<8x1xf32>
    %55 = vector.shape_cast %54 : vector<8x1xf32> to vector<8x1xf32>
    %56 = vector.broadcast %55 : vector<8x1xf32> to vector<8x32xf32>
    %57 = arith.select %53, %56, %45 : vector<8x32xi1>, vector<8x32xf32>
    %cst_11 = arith.constant 0.000000e+00 : f32
    %58 = vector.broadcast %cst_11 : f32 to vector<8x32xf32>
    %cst_12 = arith.constant 0.000000e+00 : f32
    %59 = vector.broadcast %cst_12 : f32 to vector<8x32xf32>
    %c0_13 = arith.constant 0 : index
    %c0_14 = arith.constant 0 : index
    %c0_15 = arith.constant 0 : index
    %c0_16 = arith.constant 0 : index
    %60 = vector.load %arg2[%c0_13, %c0_14, %c0_15, %c0_16] : memref<4x8x8x32xf32, #tpu.memory_space<vmem>>, vector<1x1x8x32xf32>
    %61 = vector.shape_cast %60 : vector<1x1x8x32xf32> to vector<8x32xf32>
    %62 = vector.extract_strided_slice %51 {offsets = [0, 0], sizes = [1, 32], strides = [1, 1]} : vector<8x32xf32> to vector<1x32xf32>
    %63 = vector.broadcast %62 : vector<1x32xf32> to vector<8x32xf32>
    %64 = arith.mulf %63, %61 : vector<8x32xf32>
    %65 = arith.addf %58, %64 : vector<8x32xf32>
    %66 = vector.extract_strided_slice %57 {offsets = [0, 0], sizes = [1, 32], strides = [1, 1]} : vector<8x32xf32> to vector<1x32xf32>
    %67 = vector.broadcast %66 : vector<1x32xf32> to vector<8x32xf32>
    %68 = arith.mulf %67, %61 : vector<8x32xf32>
    %69 = arith.addf %59, %68 : vector<8x32xf32>
    %c0_17 = arith.constant 0 : index
    %c1 = arith.constant 1 : index
    %c0_18 = arith.constant 0 : index
    %c0_19 = arith.constant 0 : index
    %70 = vector.load %arg2[%c0_17, %c1, %c0_18, %c0_19] : memref<4x8x8x32xf32, #tpu.memory_space<vmem>>, vector<1x1x8x32xf32>
    %71 = vector.shape_cast %70 : vector<1x1x8x32xf32> to vector<8x32xf32>
    %72 = vector.extract_strided_slice %51 {offsets = [1, 0], sizes = [1, 32], strides = [1, 1]} : vector<8x32xf32> to vector<1x32xf32>
    %73 = vector.broadcast %72 : vector<1x32xf32> to vector<8x32xf32>
    %74 = arith.mulf %73, %71 : vector<8x32xf32>
    %75 = arith.addf %65, %74 : vector<8x32xf32>
    %76 = vector.extract_strided_slice %57 {offsets = [1, 0], sizes = [1, 32], strides = [1, 1]} : vector<8x32xf32> to vector<1x32xf32>
    %77 = vector.broadcast %76 : vector<1x32xf32> to vector<8x32xf32>
    %78 = arith.mulf %77, %71 : vector<8x32xf32>
    %79 = arith.addf %69, %78 : vector<8x32xf32>
    %c0_20 = arith.constant 0 : index
    %c2 = arith.constant 2 : index
    %c0_21 = arith.constant 0 : index
    %c0_22 = arith.constant 0 : index
    %80 = vector.load %arg2[%c0_20, %c2, %c0_21, %c0_22] : memref<4x8x8x32xf32, #tpu.memory_space<vmem>>, vector<1x1x8x32xf32>
    %81 = vector.shape_cast %80 : vector<1x1x8x32xf32> to vector<8x32xf32>
    %82 = vector.extract_strided_slice %51 {offsets = [2, 0], sizes = [1, 32], strides = [1, 1]} : vector<8x32xf32> to vector<1x32xf32>
    %83 = vector.broadcast %82 : vector<1x32xf32> to vector<8x32xf32>
    %84 = arith.mulf %83, %81 : vector<8x32xf32>
    %85 = arith.addf %75, %84 : vector<8x32xf32>
    %86 = vector.extract_strided_slice %57 {offsets = [2, 0], sizes = [1, 32], strides = [1, 1]} : vector<8x32xf32> to vector<1x32xf32>
    %87 = vector.broadcast %86 : vector<1x32xf32> to vector<8x32xf32>
    %88 = arith.mulf %87, %81 : vector<8x32xf32>
    %89 = arith.addf %79, %88 : vector<8x32xf32>
    %c0_23 = arith.constant 0 : index
    %c3 = arith.constant 3 : index
    %c0_24 = arith.constant 0 : index
    %c0_25 = arith.constant 0 : index
    %90 = vector.load %arg2[%c0_23, %c3, %c0_24, %c0_25] : memref<4x8x8x32xf32, #tpu.memory_space<vmem>>, vector<1x1x8x32xf32>
    %91 = vector.shape_cast %90 : vector<1x1x8x32xf32> to vector<8x32xf32>
    %92 = vector.extract_strided_slice %51 {offsets = [3, 0], sizes = [1, 32], strides = [1, 1]} : vector<8x32xf32> to vector<1x32xf32>
    %93 = vector.broadcast %92 : vector<1x32xf32> to vector<8x32xf32>
    %94 = arith.mulf %93, %91 : vector<8x32xf32>
    %95 = arith.addf %85, %94 : vector<8x32xf32>
    %96 = vector.extract_strided_slice %57 {offsets = [3, 0], sizes = [1, 32], strides = [1, 1]} : vector<8x32xf32> to vector<1x32xf32>
    %97 = vector.broadcast %96 : vector<1x32xf32> to vector<8x32xf32>
    %98 = arith.mulf %97, %91 : vector<8x32xf32>
    %99 = arith.addf %89, %98 : vector<8x32xf32>
    %c0_26 = arith.constant 0 : index
    %c4 = arith.constant 4 : index
    %c0_27 = arith.constant 0 : index
    %c0_28 = arith.constant 0 : index
    %100 = vector.load %arg2[%c0_26, %c4, %c0_27, %c0_28] : memref<4x8x8x32xf32, #tpu.memory_space<vmem>>, vector<1x1x8x32xf32>
    %101 = vector.shape_cast %100 : vector<1x1x8x32xf32> to vector<8x32xf32>
    %102 = vector.extract_strided_slice %51 {offsets = [4, 0], sizes = [1, 32], strides = [1, 1]} : vector<8x32xf32> to vector<1x32xf32>
    %103 = vector.broadcast %102 : vector<1x32xf32> to vector<8x32xf32>
    %104 = arith.mulf %103, %101 : vector<8x32xf32>
    %105 = arith.addf %95, %104 : vector<8x32xf32>
    %106 = vector.extract_strided_slice %57 {offsets = [4, 0], sizes = [1, 32], strides = [1, 1]} : vector<8x32xf32> to vector<1x32xf32>
    %107 = vector.broadcast %106 : vector<1x32xf32> to vector<8x32xf32>
    %108 = arith.mulf %107, %101 : vector<8x32xf32>
    %109 = arith.addf %99, %108 : vector<8x32xf32>
    %c0_29 = arith.constant 0 : index
    %c5 = arith.constant 5 : index
    %c0_30 = arith.constant 0 : index
    %c0_31 = arith.constant 0 : index
    %110 = vector.load %arg2[%c0_29, %c5, %c0_30, %c0_31] : memref<4x8x8x32xf32, #tpu.memory_space<vmem>>, vector<1x1x8x32xf32>
    %111 = vector.shape_cast %110 : vector<1x1x8x32xf32> to vector<8x32xf32>
    %112 = vector.extract_strided_slice %51 {offsets = [5, 0], sizes = [1, 32], strides = [1, 1]} : vector<8x32xf32> to vector<1x32xf32>
    %113 = vector.broadcast %112 : vector<1x32xf32> to vector<8x32xf32>
    %114 = arith.mulf %113, %111 : vector<8x32xf32>
    %115 = arith.addf %105, %114 : vector<8x32xf32>
    %116 = vector.extract_strided_slice %57 {offsets = [5, 0], sizes = [1, 32], strides = [1, 1]} : vector<8x32xf32> to vector<1x32xf32>
    %117 = vector.broadcast %116 : vector<1x32xf32> to vector<8x32xf32>
    %118 = arith.mulf %117, %111 : vector<8x32xf32>
    %119 = arith.addf %109, %118 : vector<8x32xf32>
    %c0_32 = arith.constant 0 : index
    %c6 = arith.constant 6 : index
    %c0_33 = arith.constant 0 : index
    %c0_34 = arith.constant 0 : index
    %120 = vector.load %arg2[%c0_32, %c6, %c0_33, %c0_34] : memref<4x8x8x32xf32, #tpu.memory_space<vmem>>, vector<1x1x8x32xf32>
    %121 = vector.shape_cast %120 : vector<1x1x8x32xf32> to vector<8x32xf32>
    %122 = vector.extract_strided_slice %51 {offsets = [6, 0], sizes = [1, 32], strides = [1, 1]} : vector<8x32xf32> to vector<1x32xf32>
    %123 = vector.broadcast %122 : vector<1x32xf32> to vector<8x32xf32>
    %124 = arith.mulf %123, %121 : vector<8x32xf32>
    %125 = arith.addf %115, %124 : vector<8x32xf32>
    %126 = vector.extract_strided_slice %57 {offsets = [6, 0], sizes = [1, 32], strides = [1, 1]} : vector<8x32xf32> to vector<1x32xf32>
    %127 = vector.broadcast %126 : vector<1x32xf32> to vector<8x32xf32>
    %128 = arith.mulf %127, %121 : vector<8x32xf32>
    %129 = arith.addf %119, %128 : vector<8x32xf32>
    %c0_35 = arith.constant 0 : index
    %c7 = arith.constant 7 : index
    %c0_36 = arith.constant 0 : index
    %c0_37 = arith.constant 0 : index
    %130 = vector.load %arg2[%c0_35, %c7, %c0_36, %c0_37] : memref<4x8x8x32xf32, #tpu.memory_space<vmem>>, vector<1x1x8x32xf32>
    %131 = vector.shape_cast %130 : vector<1x1x8x32xf32> to vector<8x32xf32>
    %132 = vector.extract_strided_slice %51 {offsets = [7, 0], sizes = [1, 32], strides = [1, 1]} : vector<8x32xf32> to vector<1x32xf32>
    %133 = vector.broadcast %132 : vector<1x32xf32> to vector<8x32xf32>
    %134 = arith.mulf %133, %131 : vector<8x32xf32>
    %135 = arith.addf %125, %134 : vector<8x32xf32>
    %136 = vector.extract_strided_slice %57 {offsets = [7, 0], sizes = [1, 32], strides = [1, 1]} : vector<8x32xf32> to vector<1x32xf32>
    %137 = vector.broadcast %136 : vector<1x32xf32> to vector<8x32xf32>
    %138 = arith.mulf %137, %131 : vector<8x32xf32>
    %139 = arith.addf %129, %138 : vector<8x32xf32>
    %cst_38 = arith.constant 0.000000e+00 : f32
    %140 = vector.broadcast %cst_38 : f32 to vector<8x32xf32>
    %141 = arith.maximumf %135, %140 : vector<8x32xf32>
    %cst_39 = arith.constant 0.000000e+00 : f32
    %142 = vector.broadcast %cst_39 : f32 to vector<8x32xf32>
    %143 = arith.maximumf %139, %142 : vector<8x32xf32>
    %144 = arith.addf %141, %143 : vector<8x32xf32>
    %cst_40 = arith.constant 0.000000e+00 : f32
    %145 = vector.broadcast %cst_40 : f32 to vector<8x32xf32>
    %146 = vector.extract_strided_slice %144 {offsets = [0, 0], sizes = [1, 32], strides = [1, 1]} : vector<8x32xf32> to vector<1x32xf32>
    %c0_41 = arith.constant 0 : index
    %c0_42 = arith.constant 0 : index
    %c0_43 = arith.constant 0 : index
    %c0_44 = arith.constant 0 : index
    %147 = vector.load %arg3[%c0_41, %c0_42, %c0_43, %c0_44] : memref<4x8x8x32xf32, #tpu.memory_space<vmem>>, vector<1x1x8x32xf32>
    %148 = vector.shape_cast %147 : vector<1x1x8x32xf32> to vector<8x32xf32>
    %149 = vector.broadcast %146 : vector<1x32xf32> to vector<8x32xf32>
    %150 = arith.mulf %149, %148 : vector<8x32xf32>
    %151 = arith.addf %145, %150 : vector<8x32xf32>
    %152 = vector.extract_strided_slice %144 {offsets = [1, 0], sizes = [1, 32], strides = [1, 1]} : vector<8x32xf32> to vector<1x32xf32>
    %c0_45 = arith.constant 0 : index
    %c1_46 = arith.constant 1 : index
    %c0_47 = arith.constant 0 : index
    %c0_48 = arith.constant 0 : index
    %153 = vector.load %arg3[%c0_45, %c1_46, %c0_47, %c0_48] : memref<4x8x8x32xf32, #tpu.memory_space<vmem>>, vector<1x1x8x32xf32>
    %154 = vector.shape_cast %153 : vector<1x1x8x32xf32> to vector<8x32xf32>
    %155 = vector.broadcast %152 : vector<1x32xf32> to vector<8x32xf32>
    %156 = arith.mulf %155, %154 : vector<8x32xf32>
    %157 = arith.addf %151, %156 : vector<8x32xf32>
    %158 = vector.extract_strided_slice %144 {offsets = [2, 0], sizes = [1, 32], strides = [1, 1]} : vector<8x32xf32> to vector<1x32xf32>
    %c0_49 = arith.constant 0 : index
    %c2_50 = arith.constant 2 : index
    %c0_51 = arith.constant 0 : index
    %c0_52 = arith.constant 0 : index
    %159 = vector.load %arg3[%c0_49, %c2_50, %c0_51, %c0_52] : memref<4x8x8x32xf32, #tpu.memory_space<vmem>>, vector<1x1x8x32xf32>
    %160 = vector.shape_cast %159 : vector<1x1x8x32xf32> to vector<8x32xf32>
    %161 = vector.broadcast %158 : vector<1x32xf32> to vector<8x32xf32>
    %162 = arith.mulf %161, %160 : vector<8x32xf32>
    %163 = arith.addf %157, %162 : vector<8x32xf32>
    %164 = vector.extract_strided_slice %144 {offsets = [3, 0], sizes = [1, 32], strides = [1, 1]} : vector<8x32xf32> to vector<1x32xf32>
    %c0_53 = arith.constant 0 : index
    %c3_54 = arith.constant 3 : index
    %c0_55 = arith.constant 0 : index
    %c0_56 = arith.constant 0 : index
    %165 = vector.load %arg3[%c0_53, %c3_54, %c0_55, %c0_56] : memref<4x8x8x32xf32, #tpu.memory_space<vmem>>, vector<1x1x8x32xf32>
    %166 = vector.shape_cast %165 : vector<1x1x8x32xf32> to vector<8x32xf32>
    %167 = vector.broadcast %164 : vector<1x32xf32> to vector<8x32xf32>
    %168 = arith.mulf %167, %166 : vector<8x32xf32>
    %169 = arith.addf %163, %168 : vector<8x32xf32>
    %170 = vector.extract_strided_slice %144 {offsets = [4, 0], sizes = [1, 32], strides = [1, 1]} : vector<8x32xf32> to vector<1x32xf32>
    %c0_57 = arith.constant 0 : index
    %c4_58 = arith.constant 4 : index
    %c0_59 = arith.constant 0 : index
    %c0_60 = arith.constant 0 : index
    %171 = vector.load %arg3[%c0_57, %c4_58, %c0_59, %c0_60] : memref<4x8x8x32xf32, #tpu.memory_space<vmem>>, vector<1x1x8x32xf32>
    %172 = vector.shape_cast %171 : vector<1x1x8x32xf32> to vector<8x32xf32>
    %173 = vector.broadcast %170 : vector<1x32xf32> to vector<8x32xf32>
    %174 = arith.mulf %173, %172 : vector<8x32xf32>
    %175 = arith.addf %169, %174 : vector<8x32xf32>
    %176 = vector.extract_strided_slice %144 {offsets = [5, 0], sizes = [1, 32], strides = [1, 1]} : vector<8x32xf32> to vector<1x32xf32>
    %c0_61 = arith.constant 0 : index
    %c5_62 = arith.constant 5 : index
    %c0_63 = arith.constant 0 : index
    %c0_64 = arith.constant 0 : index
    %177 = vector.load %arg3[%c0_61, %c5_62, %c0_63, %c0_64] : memref<4x8x8x32xf32, #tpu.memory_space<vmem>>, vector<1x1x8x32xf32>
    %178 = vector.shape_cast %177 : vector<1x1x8x32xf32> to vector<8x32xf32>
    %179 = vector.broadcast %176 : vector<1x32xf32> to vector<8x32xf32>
    %180 = arith.mulf %179, %178 : vector<8x32xf32>
    %181 = arith.addf %175, %180 : vector<8x32xf32>
    %182 = vector.extract_strided_slice %144 {offsets = [6, 0], sizes = [1, 32], strides = [1, 1]} : vector<8x32xf32> to vector<1x32xf32>
    %c0_65 = arith.constant 0 : index
    %c6_66 = arith.constant 6 : index
    %c0_67 = arith.constant 0 : index
    %c0_68 = arith.constant 0 : index
    %183 = vector.load %arg3[%c0_65, %c6_66, %c0_67, %c0_68] : memref<4x8x8x32xf32, #tpu.memory_space<vmem>>, vector<1x1x8x32xf32>
    %184 = vector.shape_cast %183 : vector<1x1x8x32xf32> to vector<8x32xf32>
    %185 = vector.broadcast %182 : vector<1x32xf32> to vector<8x32xf32>
    %186 = arith.mulf %185, %184 : vector<8x32xf32>
    %187 = arith.addf %181, %186 : vector<8x32xf32>
    %188 = vector.extract_strided_slice %144 {offsets = [7, 0], sizes = [1, 32], strides = [1, 1]} : vector<8x32xf32> to vector<1x32xf32>
    %c0_69 = arith.constant 0 : index
    %c7_70 = arith.constant 7 : index
    %c0_71 = arith.constant 0 : index
    %c0_72 = arith.constant 0 : index
    %189 = vector.load %arg3[%c0_69, %c7_70, %c0_71, %c0_72] : memref<4x8x8x32xf32, #tpu.memory_space<vmem>>, vector<1x1x8x32xf32>
    %190 = vector.shape_cast %189 : vector<1x1x8x32xf32> to vector<8x32xf32>
    %191 = vector.broadcast %188 : vector<1x32xf32> to vector<8x32xf32>
    %192 = arith.mulf %191, %190 : vector<8x32xf32>
    %193 = arith.addf %187, %192 : vector<8x32xf32>
    %194 = math.absf %193 : vector<8x32xf32>
    %cst_73 = arith.constant 0.000000e+00 : f32
    %195 = vector.broadcast %cst_73 : f32 to vector<8x32xf32>
    %196 = arith.subf %195, %194 : vector<8x32xf32>
    %197 = math.exp %196 : vector<8x32xf32>
    %cst_74 = arith.constant 0.000000e+00 : f32
    %198 = vector.broadcast %cst_74 : f32 to vector<8x32xf32>
    %199 = arith.cmpf oge, %193, %198 : vector<8x32xf32>
    %cst_75 = arith.constant 1.000000e+00 : f32
    %200 = vector.broadcast %cst_75 : f32 to vector<8x32xf32>
    %201 = arith.addf %200, %197 : vector<8x32xf32>
    %cst_76 = arith.constant 1.000000e+00 : f32
    %202 = vector.broadcast %cst_76 : f32 to vector<8x32xf32>
    %203 = arith.divf %202, %201 : vector<8x32xf32>
    %cst_77 = arith.constant 1.000000e+00 : f32
    %204 = vector.broadcast %cst_77 : f32 to vector<8x32xf32>
    %205 = arith.addf %204, %197 : vector<8x32xf32>
    %206 = arith.divf %197, %205 : vector<8x32xf32>
    %207 = arith.select %199, %203, %206 : vector<8x32xi1>, vector<8x32xf32>
    %c0_78 = arith.constant 0 : index
    %c0_79 = arith.constant 0 : index
    %c0_80 = arith.constant 0 : index
    %208 = vector.load %arg4[%c0_78, %c0_79, %c0_80] : memref<4x8x32xf32, #tpu.memory_space<vmem>>, vector<1x8x32xf32>
    %209 = vector.shape_cast %208 : vector<1x8x32xf32> to vector<8x32xf32>
    %210 = vector.shape_cast %207 : vector<8x32xf32> to vector<1x8x32xf32>
    tpu.vector_store %arg4[%c0_78, %c0_79, %c0_80], %210 {strides = array<i32>} : memref<4x8x32xf32, #tpu.memory_space<vmem>>, vector<1x8x32xf32>,
    %cst_81 = arith.constant 0.000000e+00 : f32
    %211 = vector.broadcast %cst_81 : f32 to vector<8x32xf32>
    %cst_82 = arith.constant 0.000000e+00 : f32
    %212 = vector.broadcast %cst_82 : f32 to vector<8x32xf32>
    %c1_83 = arith.constant 1 : index
    %c0_84 = arith.constant 0 : index
    %c0_85 = arith.constant 0 : index
    %c0_86 = arith.constant 0 : index
    %213 = vector.load %arg2[%c1_83, %c0_84, %c0_85, %c0_86] : memref<4x8x8x32xf32, #tpu.memory_space<vmem>>, vector<1x1x8x32xf32>
    %214 = vector.shape_cast %213 : vector<1x1x8x32xf32> to vector<8x32xf32>
    %215 = vector.extract_strided_slice %51 {offsets = [0, 0], sizes = [1, 32], strides = [1, 1]} : vector<8x32xf32> to vector<1x32xf32>
    %216 = vector.broadcast %215 : vector<1x32xf32> to vector<8x32xf32>
    %217 = arith.mulf %216, %214 : vector<8x32xf32>
    %218 = arith.addf %211, %217 : vector<8x32xf32>
    %219 = vector.extract_strided_slice %57 {offsets = [0, 0], sizes = [1, 32], strides = [1, 1]} : vector<8x32xf32> to vector<1x32xf32>
    %220 = vector.broadcast %219 : vector<1x32xf32> to vector<8x32xf32>
    %221 = arith.mulf %220, %214 : vector<8x32xf32>
    %222 = arith.addf %212, %221 : vector<8x32xf32>
    %c1_87 = arith.constant 1 : index
    %c1_88 = arith.constant 1 : index
    %c0_89 = arith.constant 0 : index
    %c0_90 = arith.constant 0 : index
    %223 = vector.load %arg2[%c1_87, %c1_88, %c0_89, %c0_90] : memref<4x8x8x32xf32, #tpu.memory_space<vmem>>, vector<1x1x8x32xf32>
    %224 = vector.shape_cast %223 : vector<1x1x8x32xf32> to vector<8x32xf32>
    %225 = vector.extract_strided_slice %51 {offsets = [1, 0], sizes = [1, 32], strides = [1, 1]} : vector<8x32xf32> to vector<1x32xf32>
    %226 = vector.broadcast %225 : vector<1x32xf32> to vector<8x32xf32>
    %227 = arith.mulf %226, %224 : vector<8x32xf32>
    %228 = arith.addf %218, %227 : vector<8x32xf32>
    %229 = vector.extract_strided_slice %57 {offsets = [1, 0], sizes = [1, 32], strides = [1, 1]} : vector<8x32xf32> to vector<1x32xf32>
    %230 = vector.broadcast %229 : vector<1x32xf32> to vector<8x32xf32>
    %231 = arith.mulf %230, %224 : vector<8x32xf32>
    %232 = arith.addf %222, %231 : vector<8x32xf32>
    %c1_91 = arith.constant 1 : index
    %c2_92 = arith.constant 2 : index
    %c0_93 = arith.constant 0 : index
    %c0_94 = arith.constant 0 : index
    %233 = vector.load %arg2[%c1_91, %c2_92, %c0_93, %c0_94] : memref<4x8x8x32xf32, #tpu.memory_space<vmem>>, vector<1x1x8x32xf32>
    %234 = vector.shape_cast %233 : vector<1x1x8x32xf32> to vector<8x32xf32>
    %235 = vector.extract_strided_slice %51 {offsets = [2, 0], sizes = [1, 32], strides = [1, 1]} : vector<8x32xf32> to vector<1x32xf32>
    %236 = vector.broadcast %235 : vector<1x32xf32> to vector<8x32xf32>
    %237 = arith.mulf %236, %234 : vector<8x32xf32>
    %238 = arith.addf %228, %237 : vector<8x32xf32>
    %239 = vector.extract_strided_slice %57 {offsets = [2, 0], sizes = [1, 32], strides = [1, 1]} : vector<8x32xf32> to vector<1x32xf32>
    %240 = vector.broadcast %239 : vector<1x32xf32> to vector<8x32xf32>
    %241 = arith.mulf %240, %234 : vector<8x32xf32>
    %242 = arith.addf %232, %241 : vector<8x32xf32>
    %c1_95 = arith.constant 1 : index
    %c3_96 = arith.constant 3 : index
    %c0_97 = arith.constant 0 : index
    %c0_98 = arith.constant 0 : index
    %243 = vector.load %arg2[%c1_95, %c3_96, %c0_97, %c0_98] : memref<4x8x8x32xf32, #tpu.memory_space<vmem>>, vector<1x1x8x32xf32>
    %244 = vector.shape_cast %243 : vector<1x1x8x32xf32> to vector<8x32xf32>
    %245 = vector.extract_strided_slice %51 {offsets = [3, 0], sizes = [1, 32], strides = [1, 1]} : vector<8x32xf32> to vector<1x32xf32>
    %246 = vector.broadcast %245 : vector<1x32xf32> to vector<8x32xf32>
    %247 = arith.mulf %246, %244 : vector<8x32xf32>
    %248 = arith.addf %238, %247 : vector<8x32xf32>
    %249 = vector.extract_strided_slice %57 {offsets = [3, 0], sizes = [1, 32], strides = [1, 1]} : vector<8x32xf32> to vector<1x32xf32>
    %250 = vector.broadcast %249 : vector<1x32xf32> to vector<8x32xf32>
    %251 = arith.mulf %250, %244 : vector<8x32xf32>
    %252 = arith.addf %242, %251 : vector<8x32xf32>
    %c1_99 = arith.constant 1 : index
    %c4_100 = arith.constant 4 : index
    %c0_101 = arith.constant 0 : index
    %c0_102 = arith.constant 0 : index
    %253 = vector.load %arg2[%c1_99, %c4_100, %c0_101, %c0_102] : memref<4x8x8x32xf32, #tpu.memory_space<vmem>>, vector<1x1x8x32xf32>
    %254 = vector.shape_cast %253 : vector<1x1x8x32xf32> to vector<8x32xf32>
    %255 = vector.extract_strided_slice %51 {offsets = [4, 0], sizes = [1, 32], strides = [1, 1]} : vector<8x32xf32> to vector<1x32xf32>
    %256 = vector.broadcast %255 : vector<1x32xf32> to vector<8x32xf32>
    %257 = arith.mulf %256, %254 : vector<8x32xf32>
    %258 = arith.addf %248, %257 : vector<8x32xf32>
    %259 = vector.extract_strided_slice %57 {offsets = [4, 0], sizes = [1, 32], strides = [1, 1]} : vector<8x32xf32> to vector<1x32xf32>
    %260 = vector.broadcast %259 : vector<1x32xf32> to vector<8x32xf32>
    %261 = arith.mulf %260, %254 : vector<8x32xf32>
    %262 = arith.addf %252, %261 : vector<8x32xf32>
    %c1_103 = arith.constant 1 : index
    %c5_104 = arith.constant 5 : index
    %c0_105 = arith.constant 0 : index
    %c0_106 = arith.constant 0 : index
    %263 = vector.load %arg2[%c1_103, %c5_104, %c0_105, %c0_106] : memref<4x8x8x32xf32, #tpu.memory_space<vmem>>, vector<1x1x8x32xf32>
    %264 = vector.shape_cast %263 : vector<1x1x8x32xf32> to vector<8x32xf32>
    %265 = vector.extract_strided_slice %51 {offsets = [5, 0], sizes = [1, 32], strides = [1, 1]} : vector<8x32xf32> to vector<1x32xf32>
    %266 = vector.broadcast %265 : vector<1x32xf32> to vector<8x32xf32>
    %267 = arith.mulf %266, %264 : vector<8x32xf32>
    %268 = arith.addf %258, %267 : vector<8x32xf32>
    %269 = vector.extract_strided_slice %57 {offsets = [5, 0], sizes = [1, 32], strides = [1, 1]} : vector<8x32xf32> to vector<1x32xf32>
    %270 = vector.broadcast %269 : vector<1x32xf32> to vector<8x32xf32>
    %271 = arith.mulf %270, %264 : vector<8x32xf32>
    %272 = arith.addf %262, %271 : vector<8x32xf32>
    %c1_107 = arith.constant 1 : index
    %c6_108 = arith.constant 6 : index
    %c0_109 = arith.constant 0 : index
    %c0_110 = arith.constant 0 : index
    %273 = vector.load %arg2[%c1_107, %c6_108, %c0_109, %c0_110] : memref<4x8x8x32xf32, #tpu.memory_space<vmem>>, vector<1x1x8x32xf32>
    %274 = vector.shape_cast %273 : vector<1x1x8x32xf32> to vector<8x32xf32>
    %275 = vector.extract_strided_slice %51 {offsets = [6, 0], sizes = [1, 32], strides = [1, 1]} : vector<8x32xf32> to vector<1x32xf32>
    %276 = vector.broadcast %275 : vector<1x32xf32> to vector<8x32xf32>
    %277 = arith.mulf %276, %274 : vector<8x32xf32>
    %278 = arith.addf %268, %277 : vector<8x32xf32>
    %279 = vector.extract_strided_slice %57 {offsets = [6, 0], sizes = [1, 32], strides = [1, 1]} : vector<8x32xf32> to vector<1x32xf32>
    %280 = vector.broadcast %279 : vector<1x32xf32> to vector<8x32xf32>
    %281 = arith.mulf %280, %274 : vector<8x32xf32>
    %282 = arith.addf %272, %281 : vector<8x32xf32>
    %c1_111 = arith.constant 1 : index
    %c7_112 = arith.constant 7 : index
    %c0_113 = arith.constant 0 : index
    %c0_114 = arith.constant 0 : index
    %283 = vector.load %arg2[%c1_111, %c7_112, %c0_113, %c0_114] : memref<4x8x8x32xf32, #tpu.memory_space<vmem>>, vector<1x1x8x32xf32>
    %284 = vector.shape_cast %283 : vector<1x1x8x32xf32> to vector<8x32xf32>
    %285 = vector.extract_strided_slice %51 {offsets = [7, 0], sizes = [1, 32], strides = [1, 1]} : vector<8x32xf32> to vector<1x32xf32>
    %286 = vector.broadcast %285 : vector<1x32xf32> to vector<8x32xf32>
    %287 = arith.mulf %286, %284 : vector<8x32xf32>
    %288 = arith.addf %278, %287 : vector<8x32xf32>
    %289 = vector.extract_strided_slice %57 {offsets = [7, 0], sizes = [1, 32], strides = [1, 1]} : vector<8x32xf32> to vector<1x32xf32>
    %290 = vector.broadcast %289 : vector<1x32xf32> to vector<8x32xf32>
    %291 = arith.mulf %290, %284 : vector<8x32xf32>
    %292 = arith.addf %282, %291 : vector<8x32xf32>
    %cst_115 = arith.constant 0.000000e+00 : f32
    %293 = vector.broadcast %cst_115 : f32 to vector<8x32xf32>
    %294 = arith.maximumf %288, %293 : vector<8x32xf32>
    %cst_116 = arith.constant 0.000000e+00 : f32
    %295 = vector.broadcast %cst_116 : f32 to vector<8x32xf32>
    %296 = arith.maximumf %292, %295 : vector<8x32xf32>
    %297 = arith.addf %294, %296 : vector<8x32xf32>
    %cst_117 = arith.constant 0.000000e+00 : f32
    %298 = vector.broadcast %cst_117 : f32 to vector<8x32xf32>
    %299 = vector.extract_strided_slice %297 {offsets = [0, 0], sizes = [1, 32], strides = [1, 1]} : vector<8x32xf32> to vector<1x32xf32>
    %c1_118 = arith.constant 1 : index
    %c0_119 = arith.constant 0 : index
    %c0_120 = arith.constant 0 : index
    %c0_121 = arith.constant 0 : index
    %300 = vector.load %arg3[%c1_118, %c0_119, %c0_120, %c0_121] : memref<4x8x8x32xf32, #tpu.memory_space<vmem>>, vector<1x1x8x32xf32>
    %301 = vector.shape_cast %300 : vector<1x1x8x32xf32> to vector<8x32xf32>
    %302 = vector.broadcast %299 : vector<1x32xf32> to vector<8x32xf32>
    %303 = arith.mulf %302, %301 : vector<8x32xf32>
    %304 = arith.addf %298, %303 : vector<8x32xf32>
    %305 = vector.extract_strided_slice %297 {offsets = [1, 0], sizes = [1, 32], strides = [1, 1]} : vector<8x32xf32> to vector<1x32xf32>
    %c1_122 = arith.constant 1 : index
    %c1_123 = arith.constant 1 : index
    %c0_124 = arith.constant 0 : index
    %c0_125 = arith.constant 0 : index
    %306 = vector.load %arg3[%c1_122, %c1_123, %c0_124, %c0_125] : memref<4x8x8x32xf32, #tpu.memory_space<vmem>>, vector<1x1x8x32xf32>
    %307 = vector.shape_cast %306 : vector<1x1x8x32xf32> to vector<8x32xf32>
    %308 = vector.broadcast %305 : vector<1x32xf32> to vector<8x32xf32>
    %309 = arith.mulf %308, %307 : vector<8x32xf32>
    %310 = arith.addf %304, %309 : vector<8x32xf32>
    %311 = vector.extract_strided_slice %297 {offsets = [2, 0], sizes = [1, 32], strides = [1, 1]} : vector<8x32xf32> to vector<1x32xf32>
    %c1_126 = arith.constant 1 : index
    %c2_127 = arith.constant 2 : index
    %c0_128 = arith.constant 0 : index
    %c0_129 = arith.constant 0 : index
    %312 = vector.load %arg3[%c1_126, %c2_127, %c0_128, %c0_129] : memref<4x8x8x32xf32, #tpu.memory_space<vmem>>, vector<1x1x8x32xf32>
    %313 = vector.shape_cast %312 : vector<1x1x8x32xf32> to vector<8x32xf32>
    %314 = vector.broadcast %311 : vector<1x32xf32> to vector<8x32xf32>
    %315 = arith.mulf %314, %313 : vector<8x32xf32>
    %316 = arith.addf %310, %315 : vector<8x32xf32>
    %317 = vector.extract_strided_slice %297 {offsets = [3, 0], sizes = [1, 32], strides = [1, 1]} : vector<8x32xf32> to vector<1x32xf32>
    %c1_130 = arith.constant 1 : index
    %c3_131 = arith.constant 3 : index
    %c0_132 = arith.constant 0 : index
    %c0_133 = arith.constant 0 : index
    %318 = vector.load %arg3[%c1_130, %c3_131, %c0_132, %c0_133] : memref<4x8x8x32xf32, #tpu.memory_space<vmem>>, vector<1x1x8x32xf32>
    %319 = vector.shape_cast %318 : vector<1x1x8x32xf32> to vector<8x32xf32>
    %320 = vector.broadcast %317 : vector<1x32xf32> to vector<8x32xf32>
    %321 = arith.mulf %320, %319 : vector<8x32xf32>
    %322 = arith.addf %316, %321 : vector<8x32xf32>
    %323 = vector.extract_strided_slice %297 {offsets = [4, 0], sizes = [1, 32], strides = [1, 1]} : vector<8x32xf32> to vector<1x32xf32>
    %c1_134 = arith.constant 1 : index
    %c4_135 = arith.constant 4 : index
    %c0_136 = arith.constant 0 : index
    %c0_137 = arith.constant 0 : index
    %324 = vector.load %arg3[%c1_134, %c4_135, %c0_136, %c0_137] : memref<4x8x8x32xf32, #tpu.memory_space<vmem>>, vector<1x1x8x32xf32>
    %325 = vector.shape_cast %324 : vector<1x1x8x32xf32> to vector<8x32xf32>
    %326 = vector.broadcast %323 : vector<1x32xf32> to vector<8x32xf32>
    %327 = arith.mulf %326, %325 : vector<8x32xf32>
    %328 = arith.addf %322, %327 : vector<8x32xf32>
    %329 = vector.extract_strided_slice %297 {offsets = [5, 0], sizes = [1, 32], strides = [1, 1]} : vector<8x32xf32> to vector<1x32xf32>
    %c1_138 = arith.constant 1 : index
    %c5_139 = arith.constant 5 : index
    %c0_140 = arith.constant 0 : index
    %c0_141 = arith.constant 0 : index
    %330 = vector.load %arg3[%c1_138, %c5_139, %c0_140, %c0_141] : memref<4x8x8x32xf32, #tpu.memory_space<vmem>>, vector<1x1x8x32xf32>
    %331 = vector.shape_cast %330 : vector<1x1x8x32xf32> to vector<8x32xf32>
    %332 = vector.broadcast %329 : vector<1x32xf32> to vector<8x32xf32>
    %333 = arith.mulf %332, %331 : vector<8x32xf32>
    %334 = arith.addf %328, %333 : vector<8x32xf32>
    %335 = vector.extract_strided_slice %297 {offsets = [6, 0], sizes = [1, 32], strides = [1, 1]} : vector<8x32xf32> to vector<1x32xf32>
    %c1_142 = arith.constant 1 : index
    %c6_143 = arith.constant 6 : index
    %c0_144 = arith.constant 0 : index
    %c0_145 = arith.constant 0 : index
    %336 = vector.load %arg3[%c1_142, %c6_143, %c0_144, %c0_145] : memref<4x8x8x32xf32, #tpu.memory_space<vmem>>, vector<1x1x8x32xf32>
    %337 = vector.shape_cast %336 : vector<1x1x8x32xf32> to vector<8x32xf32>
    %338 = vector.broadcast %335 : vector<1x32xf32> to vector<8x32xf32>
    %339 = arith.mulf %338, %337 : vector<8x32xf32>
    %340 = arith.addf %334, %339 : vector<8x32xf32>
    %341 = vector.extract_strided_slice %297 {offsets = [7, 0], sizes = [1, 32], strides = [1, 1]} : vector<8x32xf32> to vector<1x32xf32>
    %c1_146 = arith.constant 1 : index
    %c7_147 = arith.constant 7 : index
    %c0_148 = arith.constant 0 : index
    %c0_149 = arith.constant 0 : index
    %342 = vector.load %arg3[%c1_146, %c7_147, %c0_148, %c0_149] : memref<4x8x8x32xf32, #tpu.memory_space<vmem>>, vector<1x1x8x32xf32>
    %343 = vector.shape_cast %342 : vector<1x1x8x32xf32> to vector<8x32xf32>
    %344 = vector.broadcast %341 : vector<1x32xf32> to vector<8x32xf32>
    %345 = arith.mulf %344, %343 : vector<8x32xf32>
    %346 = arith.addf %340, %345 : vector<8x32xf32>
    %347 = math.absf %346 : vector<8x32xf32>
    %cst_150 = arith.constant 0.000000e+00 : f32
    %348 = vector.broadcast %cst_150 : f32 to vector<8x32xf32>
    %349 = arith.subf %348, %347 : vector<8x32xf32>
    %350 = math.exp %349 : vector<8x32xf32>
    %cst_151 = arith.constant 0.000000e+00 : f32
    %351 = vector.broadcast %cst_151 : f32 to vector<8x32xf32>
    %352 = arith.cmpf oge, %346, %351 : vector<8x32xf32>
    %cst_152 = arith.constant 1.000000e+00 : f32
    %353 = vector.broadcast %cst_152 : f32 to vector<8x32xf32>
    %354 = arith.addf %353, %350 : vector<8x32xf32>
    %cst_153 = arith.constant 1.000000e+00 : f32
    %355 = vector.broadcast %cst_153 : f32 to vector<8x32xf32>
    %356 = arith.divf %355, %354 : vector<8x32xf32>
    %cst_154 = arith.constant 1.000000e+00 : f32
    %357 = vector.broadcast %cst_154 : f32 to vector<8x32xf32>
    %358 = arith.addf %357, %350 : vector<8x32xf32>
    %359 = arith.divf %350, %358 : vector<8x32xf32>
    %360 = arith.select %352, %356, %359 : vector<8x32xi1>, vector<8x32xf32>
    %c1_155 = arith.constant 1 : index
    %c0_156 = arith.constant 0 : index
    %c0_157 = arith.constant 0 : index
    %361 = vector.load %arg4[%c1_155, %c0_156, %c0_157] : memref<4x8x32xf32, #tpu.memory_space<vmem>>, vector<1x8x32xf32>
    %362 = vector.shape_cast %361 : vector<1x8x32xf32> to vector<8x32xf32>
    %363 = vector.shape_cast %360 : vector<8x32xf32> to vector<1x8x32xf32>
    tpu.vector_store %arg4[%c1_155, %c0_156, %c0_157], %363 {strides = array<i32>} : memref<4x8x32xf32, #tpu.memory_space<vmem>>, vector<1x8x32xf32>,
    %cst_158 = arith.constant 0.000000e+00 : f32
    %364 = vector.broadcast %cst_158 : f32 to vector<8x32xf32>
    %cst_159 = arith.constant 0.000000e+00 : f32
    %365 = vector.broadcast %cst_159 : f32 to vector<8x32xf32>
    %c2_160 = arith.constant 2 : index
    %c0_161 = arith.constant 0 : index
    %c0_162 = arith.constant 0 : index
    %c0_163 = arith.constant 0 : index
    %366 = vector.load %arg2[%c2_160, %c0_161, %c0_162, %c0_163] : memref<4x8x8x32xf32, #tpu.memory_space<vmem>>, vector<1x1x8x32xf32>
    %367 = vector.shape_cast %366 : vector<1x1x8x32xf32> to vector<8x32xf32>
    %368 = vector.extract_strided_slice %51 {offsets = [0, 0], sizes = [1, 32], strides = [1, 1]} : vector<8x32xf32> to vector<1x32xf32>
    %369 = vector.broadcast %368 : vector<1x32xf32> to vector<8x32xf32>
    %370 = arith.mulf %369, %367 : vector<8x32xf32>
    %371 = arith.addf %364, %370 : vector<8x32xf32>
    %372 = vector.extract_strided_slice %57 {offsets = [0, 0], sizes = [1, 32], strides = [1, 1]} : vector<8x32xf32> to vector<1x32xf32>
    %373 = vector.broadcast %372 : vector<1x32xf32> to vector<8x32xf32>
    %374 = arith.mulf %373, %367 : vector<8x32xf32>
    %375 = arith.addf %365, %374 : vector<8x32xf32>
    %c2_164 = arith.constant 2 : index
    %c1_165 = arith.constant 1 : index
    %c0_166 = arith.constant 0 : index
    %c0_167 = arith.constant 0 : index
    %376 = vector.load %arg2[%c2_164, %c1_165, %c0_166, %c0_167] : memref<4x8x8x32xf32, #tpu.memory_space<vmem>>, vector<1x1x8x32xf32>
    %377 = vector.shape_cast %376 : vector<1x1x8x32xf32> to vector<8x32xf32>
    %378 = vector.extract_strided_slice %51 {offsets = [1, 0], sizes = [1, 32], strides = [1, 1]} : vector<8x32xf32> to vector<1x32xf32>
    %379 = vector.broadcast %378 : vector<1x32xf32> to vector<8x32xf32>
    %380 = arith.mulf %379, %377 : vector<8x32xf32>
    %381 = arith.addf %371, %380 : vector<8x32xf32>
    %382 = vector.extract_strided_slice %57 {offsets = [1, 0], sizes = [1, 32], strides = [1, 1]} : vector<8x32xf32> to vector<1x32xf32>
    %383 = vector.broadcast %382 : vector<1x32xf32> to vector<8x32xf32>
    %384 = arith.mulf %383, %377 : vector<8x32xf32>
    %385 = arith.addf %375, %384 : vector<8x32xf32>
    %c2_168 = arith.constant 2 : index
    %c2_169 = arith.constant 2 : index
    %c0_170 = arith.constant 0 : index
    %c0_171 = arith.constant 0 : index
    %386 = vector.load %arg2[%c2_168, %c2_169, %c0_170, %c0_171] : memref<4x8x8x32xf32, #tpu.memory_space<vmem>>, vector<1x1x8x32xf32>
    %387 = vector.shape_cast %386 : vector<1x1x8x32xf32> to vector<8x32xf32>
    %388 = vector.extract_strided_slice %51 {offsets = [2, 0], sizes = [1, 32], strides = [1, 1]} : vector<8x32xf32> to vector<1x32xf32>
    %389 = vector.broadcast %388 : vector<1x32xf32> to vector<8x32xf32>
    %390 = arith.mulf %389, %387 : vector<8x32xf32>
    %391 = arith.addf %381, %390 : vector<8x32xf32>
    %392 = vector.extract_strided_slice %57 {offsets = [2, 0], sizes = [1, 32], strides = [1, 1]} : vector<8x32xf32> to vector<1x32xf32>
    %393 = vector.broadcast %392 : vector<1x32xf32> to vector<8x32xf32>
    %394 = arith.mulf %393, %387 : vector<8x32xf32>
    %395 = arith.addf %385, %394 : vector<8x32xf32>
    %c2_172 = arith.constant 2 : index
    %c3_173 = arith.constant 3 : index
    %c0_174 = arith.constant 0 : index
    %c0_175 = arith.constant 0 : index
    %396 = vector.load %arg2[%c2_172, %c3_173, %c0_174, %c0_175] : memref<4x8x8x32xf32, #tpu.memory_space<vmem>>, vector<1x1x8x32xf32>
    %397 = vector.shape_cast %396 : vector<1x1x8x32xf32> to vector<8x32xf32>
    %398 = vector.extract_strided_slice %51 {offsets = [3, 0], sizes = [1, 32], strides = [1, 1]} : vector<8x32xf32> to vector<1x32xf32>
    %399 = vector.broadcast %398 : vector<1x32xf32> to vector<8x32xf32>
    %400 = arith.mulf %399, %397 : vector<8x32xf32>
    %401 = arith.addf %391, %400 : vector<8x32xf32>
    %402 = vector.extract_strided_slice %57 {offsets = [3, 0], sizes = [1, 32], strides = [1, 1]} : vector<8x32xf32> to vector<1x32xf32>
    %403 = vector.broadcast %402 : vector<1x32xf32> to vector<8x32xf32>
    %404 = arith.mulf %403, %397 : vector<8x32xf32>
    %405 = arith.addf %395, %404 : vector<8x32xf32>
    %c2_176 = arith.constant 2 : index
    %c4_177 = arith.constant 4 : index
    %c0_178 = arith.constant 0 : index
    %c0_179 = arith.constant 0 : index
    %406 = vector.load %arg2[%c2_176, %c4_177, %c0_178, %c0_179] : memref<4x8x8x32xf32, #tpu.memory_space<vmem>>, vector<1x1x8x32xf32>
    %407 = vector.shape_cast %406 : vector<1x1x8x32xf32> to vector<8x32xf32>
    %408 = vector.extract_strided_slice %51 {offsets = [4, 0], sizes = [1, 32], strides = [1, 1]} : vector<8x32xf32> to vector<1x32xf32>
    %409 = vector.broadcast %408 : vector<1x32xf32> to vector<8x32xf32>
    %410 = arith.mulf %409, %407 : vector<8x32xf32>
    %411 = arith.addf %401, %410 : vector<8x32xf32>
    %412 = vector.extract_strided_slice %57 {offsets = [4, 0], sizes = [1, 32], strides = [1, 1]} : vector<8x32xf32> to vector<1x32xf32>
    %413 = vector.broadcast %412 : vector<1x32xf32> to vector<8x32xf32>
    %414 = arith.mulf %413, %407 : vector<8x32xf32>
    %415 = arith.addf %405, %414 : vector<8x32xf32>
    %c2_180 = arith.constant 2 : index
    %c5_181 = arith.constant 5 : index
    %c0_182 = arith.constant 0 : index
    %c0_183 = arith.constant 0 : index
    %416 = vector.load %arg2[%c2_180, %c5_181, %c0_182, %c0_183] : memref<4x8x8x32xf32, #tpu.memory_space<vmem>>, vector<1x1x8x32xf32>
    %417 = vector.shape_cast %416 : vector<1x1x8x32xf32> to vector<8x32xf32>
    %418 = vector.extract_strided_slice %51 {offsets = [5, 0], sizes = [1, 32], strides = [1, 1]} : vector<8x32xf32> to vector<1x32xf32>
    %419 = vector.broadcast %418 : vector<1x32xf32> to vector<8x32xf32>
    %420 = arith.mulf %419, %417 : vector<8x32xf32>
    %421 = arith.addf %411, %420 : vector<8x32xf32>
    %422 = vector.extract_strided_slice %57 {offsets = [5, 0], sizes = [1, 32], strides = [1, 1]} : vector<8x32xf32> to vector<1x32xf32>
    %423 = vector.broadcast %422 : vector<1x32xf32> to vector<8x32xf32>
    %424 = arith.mulf %423, %417 : vector<8x32xf32>
    %425 = arith.addf %415, %424 : vector<8x32xf32>
    %c2_184 = arith.constant 2 : index
    %c6_185 = arith.constant 6 : index
    %c0_186 = arith.constant 0 : index
    %c0_187 = arith.constant 0 : index
    %426 = vector.load %arg2[%c2_184, %c6_185, %c0_186, %c0_187] : memref<4x8x8x32xf32, #tpu.memory_space<vmem>>, vector<1x1x8x32xf32>
    %427 = vector.shape_cast %426 : vector<1x1x8x32xf32> to vector<8x32xf32>
    %428 = vector.extract_strided_slice %51 {offsets = [6, 0], sizes = [1, 32], strides = [1, 1]} : vector<8x32xf32> to vector<1x32xf32>
    %429 = vector.broadcast %428 : vector<1x32xf32> to vector<8x32xf32>
    %430 = arith.mulf %429, %427 : vector<8x32xf32>
    %431 = arith.addf %421, %430 : vector<8x32xf32>
    %432 = vector.extract_strided_slice %57 {offsets = [6, 0], sizes = [1, 32], strides = [1, 1]} : vector<8x32xf32> to vector<1x32xf32>
    %433 = vector.broadcast %432 : vector<1x32xf32> to vector<8x32xf32>
    %434 = arith.mulf %433, %427 : vector<8x32xf32>
    %435 = arith.addf %425, %434 : vector<8x32xf32>
    %c2_188 = arith.constant 2 : index
    %c7_189 = arith.constant 7 : index
    %c0_190 = arith.constant 0 : index
    %c0_191 = arith.constant 0 : index
    %436 = vector.load %arg2[%c2_188, %c7_189, %c0_190, %c0_191] : memref<4x8x8x32xf32, #tpu.memory_space<vmem>>, vector<1x1x8x32xf32>
    %437 = vector.shape_cast %436 : vector<1x1x8x32xf32> to vector<8x32xf32>
    %438 = vector.extract_strided_slice %51 {offsets = [7, 0], sizes = [1, 32], strides = [1, 1]} : vector<8x32xf32> to vector<1x32xf32>
    %439 = vector.broadcast %438 : vector<1x32xf32> to vector<8x32xf32>
    %440 = arith.mulf %439, %437 : vector<8x32xf32>
    %441 = arith.addf %431, %440 : vector<8x32xf32>
    %442 = vector.extract_strided_slice %57 {offsets = [7, 0], sizes = [1, 32], strides = [1, 1]} : vector<8x32xf32> to vector<1x32xf32>
    %443 = vector.broadcast %442 : vector<1x32xf32> to vector<8x32xf32>
    %444 = arith.mulf %443, %437 : vector<8x32xf32>
    %445 = arith.addf %435, %444 : vector<8x32xf32>
    %cst_192 = arith.constant 0.000000e+00 : f32
    %446 = vector.broadcast %cst_192 : f32 to vector<8x32xf32>
    %447 = arith.maximumf %441, %446 : vector<8x32xf32>
    %cst_193 = arith.constant 0.000000e+00 : f32
    %448 = vector.broadcast %cst_193 : f32 to vector<8x32xf32>
    %449 = arith.maximumf %445, %448 : vector<8x32xf32>
    %450 = arith.addf %447, %449 : vector<8x32xf32>
    %cst_194 = arith.constant 0.000000e+00 : f32
    %451 = vector.broadcast %cst_194 : f32 to vector<8x32xf32>
    %452 = vector.extract_strided_slice %450 {offsets = [0, 0], sizes = [1, 32], strides = [1, 1]} : vector<8x32xf32> to vector<1x32xf32>
    %c2_195 = arith.constant 2 : index
    %c0_196 = arith.constant 0 : index
    %c0_197 = arith.constant 0 : index
    %c0_198 = arith.constant 0 : index
    %453 = vector.load %arg3[%c2_195, %c0_196, %c0_197, %c0_198] : memref<4x8x8x32xf32, #tpu.memory_space<vmem>>, vector<1x1x8x32xf32>
    %454 = vector.shape_cast %453 : vector<1x1x8x32xf32> to vector<8x32xf32>
    %455 = vector.broadcast %452 : vector<1x32xf32> to vector<8x32xf32>
    %456 = arith.mulf %455, %454 : vector<8x32xf32>
    %457 = arith.addf %451, %456 : vector<8x32xf32>
    %458 = vector.extract_strided_slice %450 {offsets = [1, 0], sizes = [1, 32], strides = [1, 1]} : vector<8x32xf32> to vector<1x32xf32>
    %c2_199 = arith.constant 2 : index
    %c1_200 = arith.constant 1 : index
    %c0_201 = arith.constant 0 : index
    %c0_202 = arith.constant 0 : index
    %459 = vector.load %arg3[%c2_199, %c1_200, %c0_201, %c0_202] : memref<4x8x8x32xf32, #tpu.memory_space<vmem>>, vector<1x1x8x32xf32>
    %460 = vector.shape_cast %459 : vector<1x1x8x32xf32> to vector<8x32xf32>
    %461 = vector.broadcast %458 : vector<1x32xf32> to vector<8x32xf32>
    %462 = arith.mulf %461, %460 : vector<8x32xf32>
    %463 = arith.addf %457, %462 : vector<8x32xf32>
    %464 = vector.extract_strided_slice %450 {offsets = [2, 0], sizes = [1, 32], strides = [1, 1]} : vector<8x32xf32> to vector<1x32xf32>
    %c2_203 = arith.constant 2 : index
    %c2_204 = arith.constant 2 : index
    %c0_205 = arith.constant 0 : index
    %c0_206 = arith.constant 0 : index
    %465 = vector.load %arg3[%c2_203, %c2_204, %c0_205, %c0_206] : memref<4x8x8x32xf32, #tpu.memory_space<vmem>>, vector<1x1x8x32xf32>
    %466 = vector.shape_cast %465 : vector<1x1x8x32xf32> to vector<8x32xf32>
    %467 = vector.broadcast %464 : vector<1x32xf32> to vector<8x32xf32>
    %468 = arith.mulf %467, %466 : vector<8x32xf32>
    %469 = arith.addf %463, %468 : vector<8x32xf32>
    %470 = vector.extract_strided_slice %450 {offsets = [3, 0], sizes = [1, 32], strides = [1, 1]} : vector<8x32xf32> to vector<1x32xf32>
    %c2_207 = arith.constant 2 : index
    %c3_208 = arith.constant 3 : index
    %c0_209 = arith.constant 0 : index
    %c0_210 = arith.constant 0 : index
    %471 = vector.load %arg3[%c2_207, %c3_208, %c0_209, %c0_210] : memref<4x8x8x32xf32, #tpu.memory_space<vmem>>, vector<1x1x8x32xf32>
    %472 = vector.shape_cast %471 : vector<1x1x8x32xf32> to vector<8x32xf32>
    %473 = vector.broadcast %470 : vector<1x32xf32> to vector<8x32xf32>
    %474 = arith.mulf %473, %472 : vector<8x32xf32>
    %475 = arith.addf %469, %474 : vector<8x32xf32>
    %476 = vector.extract_strided_slice %450 {offsets = [4, 0], sizes = [1, 32], strides = [1, 1]} : vector<8x32xf32> to vector<1x32xf32>
    %c2_211 = arith.constant 2 : index
    %c4_212 = arith.constant 4 : index
    %c0_213 = arith.constant 0 : index
    %c0_214 = arith.constant 0 : index
    %477 = vector.load %arg3[%c2_211, %c4_212, %c0_213, %c0_214] : memref<4x8x8x32xf32, #tpu.memory_space<vmem>>, vector<1x1x8x32xf32>
    %478 = vector.shape_cast %477 : vector<1x1x8x32xf32> to vector<8x32xf32>
    %479 = vector.broadcast %476 : vector<1x32xf32> to vector<8x32xf32>
    %480 = arith.mulf %479, %478 : vector<8x32xf32>
    %481 = arith.addf %475, %480 : vector<8x32xf32>
    %482 = vector.extract_strided_slice %450 {offsets = [5, 0], sizes = [1, 32], strides = [1, 1]} : vector<8x32xf32> to vector<1x32xf32>
    %c2_215 = arith.constant 2 : index
    %c5_216 = arith.constant 5 : index
    %c0_217 = arith.constant 0 : index
    %c0_218 = arith.constant 0 : index
    %483 = vector.load %arg3[%c2_215, %c5_216, %c0_217, %c0_218] : memref<4x8x8x32xf32, #tpu.memory_space<vmem>>, vector<1x1x8x32xf32>
    %484 = vector.shape_cast %483 : vector<1x1x8x32xf32> to vector<8x32xf32>
    %485 = vector.broadcast %482 : vector<1x32xf32> to vector<8x32xf32>
    %486 = arith.mulf %485, %484 : vector<8x32xf32>
    %487 = arith.addf %481, %486 : vector<8x32xf32>
    %488 = vector.extract_strided_slice %450 {offsets = [6, 0], sizes = [1, 32], strides = [1, 1]} : vector<8x32xf32> to vector<1x32xf32>
    %c2_219 = arith.constant 2 : index
    %c6_220 = arith.constant 6 : index
    %c0_221 = arith.constant 0 : index
    %c0_222 = arith.constant 0 : index
    %489 = vector.load %arg3[%c2_219, %c6_220, %c0_221, %c0_222] : memref<4x8x8x32xf32, #tpu.memory_space<vmem>>, vector<1x1x8x32xf32>
    %490 = vector.shape_cast %489 : vector<1x1x8x32xf32> to vector<8x32xf32>
    %491 = vector.broadcast %488 : vector<1x32xf32> to vector<8x32xf32>
    %492 = arith.mulf %491, %490 : vector<8x32xf32>
    %493 = arith.addf %487, %492 : vector<8x32xf32>
    %494 = vector.extract_strided_slice %450 {offsets = [7, 0], sizes = [1, 32], strides = [1, 1]} : vector<8x32xf32> to vector<1x32xf32>
    %c2_223 = arith.constant 2 : index
    %c7_224 = arith.constant 7 : index
    %c0_225 = arith.constant 0 : index
    %c0_226 = arith.constant 0 : index
    %495 = vector.load %arg3[%c2_223, %c7_224, %c0_225, %c0_226] : memref<4x8x8x32xf32, #tpu.memory_space<vmem>>, vector<1x1x8x32xf32>
    %496 = vector.shape_cast %495 : vector<1x1x8x32xf32> to vector<8x32xf32>
    %497 = vector.broadcast %494 : vector<1x32xf32> to vector<8x32xf32>
    %498 = arith.mulf %497, %496 : vector<8x32xf32>
    %499 = arith.addf %493, %498 : vector<8x32xf32>
    %500 = math.absf %499 : vector<8x32xf32>
    %cst_227 = arith.constant 0.000000e+00 : f32
    %501 = vector.broadcast %cst_227 : f32 to vector<8x32xf32>
    %502 = arith.subf %501, %500 : vector<8x32xf32>
    %503 = math.exp %502 : vector<8x32xf32>
    %cst_228 = arith.constant 0.000000e+00 : f32
    %504 = vector.broadcast %cst_228 : f32 to vector<8x32xf32>
    %505 = arith.cmpf oge, %499, %504 : vector<8x32xf32>
    %cst_229 = arith.constant 1.000000e+00 : f32
    %506 = vector.broadcast %cst_229 : f32 to vector<8x32xf32>
    %507 = arith.addf %506, %503 : vector<8x32xf32>
    %cst_230 = arith.constant 1.000000e+00 : f32
    %508 = vector.broadcast %cst_230 : f32 to vector<8x32xf32>
    %509 = arith.divf %508, %507 : vector<8x32xf32>
    %cst_231 = arith.constant 1.000000e+00 : f32
    %510 = vector.broadcast %cst_231 : f32 to vector<8x32xf32>
    %511 = arith.addf %510, %503 : vector<8x32xf32>
    %512 = arith.divf %503, %511 : vector<8x32xf32>
    %513 = arith.select %505, %509, %512 : vector<8x32xi1>, vector<8x32xf32>
    %c2_232 = arith.constant 2 : index
    %c0_233 = arith.constant 0 : index
    %c0_234 = arith.constant 0 : index
    %514 = vector.load %arg4[%c2_232, %c0_233, %c0_234] : memref<4x8x32xf32, #tpu.memory_space<vmem>>, vector<1x8x32xf32>
    %515 = vector.shape_cast %514 : vector<1x8x32xf32> to vector<8x32xf32>
    %516 = vector.shape_cast %513 : vector<8x32xf32> to vector<1x8x32xf32>
    tpu.vector_store %arg4[%c2_232, %c0_233, %c0_234], %516 {strides = array<i32>} : memref<4x8x32xf32, #tpu.memory_space<vmem>>, vector<1x8x32xf32>,
    %cst_235 = arith.constant 0.000000e+00 : f32
    %517 = vector.broadcast %cst_235 : f32 to vector<8x32xf32>
    %cst_236 = arith.constant 0.000000e+00 : f32
    %518 = vector.broadcast %cst_236 : f32 to vector<8x32xf32>
    %c3_237 = arith.constant 3 : index
    %c0_238 = arith.constant 0 : index
    %c0_239 = arith.constant 0 : index
    %c0_240 = arith.constant 0 : index
    %519 = vector.load %arg2[%c3_237, %c0_238, %c0_239, %c0_240] : memref<4x8x8x32xf32, #tpu.memory_space<vmem>>, vector<1x1x8x32xf32>
    %520 = vector.shape_cast %519 : vector<1x1x8x32xf32> to vector<8x32xf32>
    %521 = vector.extract_strided_slice %51 {offsets = [0, 0], sizes = [1, 32], strides = [1, 1]} : vector<8x32xf32> to vector<1x32xf32>
    %522 = vector.broadcast %521 : vector<1x32xf32> to vector<8x32xf32>
    %523 = arith.mulf %522, %520 : vector<8x32xf32>
    %524 = arith.addf %517, %523 : vector<8x32xf32>
    %525 = vector.extract_strided_slice %57 {offsets = [0, 0], sizes = [1, 32], strides = [1, 1]} : vector<8x32xf32> to vector<1x32xf32>
    %526 = vector.broadcast %525 : vector<1x32xf32> to vector<8x32xf32>
    %527 = arith.mulf %526, %520 : vector<8x32xf32>
    %528 = arith.addf %518, %527 : vector<8x32xf32>
    %c3_241 = arith.constant 3 : index
    %c1_242 = arith.constant 1 : index
    %c0_243 = arith.constant 0 : index
    %c0_244 = arith.constant 0 : index
    %529 = vector.load %arg2[%c3_241, %c1_242, %c0_243, %c0_244] : memref<4x8x8x32xf32, #tpu.memory_space<vmem>>, vector<1x1x8x32xf32>
    %530 = vector.shape_cast %529 : vector<1x1x8x32xf32> to vector<8x32xf32>
    %531 = vector.extract_strided_slice %51 {offsets = [1, 0], sizes = [1, 32], strides = [1, 1]} : vector<8x32xf32> to vector<1x32xf32>
    %532 = vector.broadcast %531 : vector<1x32xf32> to vector<8x32xf32>
    %533 = arith.mulf %532, %530 : vector<8x32xf32>
    %534 = arith.addf %524, %533 : vector<8x32xf32>
    %535 = vector.extract_strided_slice %57 {offsets = [1, 0], sizes = [1, 32], strides = [1, 1]} : vector<8x32xf32> to vector<1x32xf32>
    %536 = vector.broadcast %535 : vector<1x32xf32> to vector<8x32xf32>
    %537 = arith.mulf %536, %530 : vector<8x32xf32>
    %538 = arith.addf %528, %537 : vector<8x32xf32>
    %c3_245 = arith.constant 3 : index
    %c2_246 = arith.constant 2 : index
    %c0_247 = arith.constant 0 : index
    %c0_248 = arith.constant 0 : index
    %539 = vector.load %arg2[%c3_245, %c2_246, %c0_247, %c0_248] : memref<4x8x8x32xf32, #tpu.memory_space<vmem>>, vector<1x1x8x32xf32>
    %540 = vector.shape_cast %539 : vector<1x1x8x32xf32> to vector<8x32xf32>
    %541 = vector.extract_strided_slice %51 {offsets = [2, 0], sizes = [1, 32], strides = [1, 1]} : vector<8x32xf32> to vector<1x32xf32>
    %542 = vector.broadcast %541 : vector<1x32xf32> to vector<8x32xf32>
    %543 = arith.mulf %542, %540 : vector<8x32xf32>
    %544 = arith.addf %534, %543 : vector<8x32xf32>
    %545 = vector.extract_strided_slice %57 {offsets = [2, 0], sizes = [1, 32], strides = [1, 1]} : vector<8x32xf32> to vector<1x32xf32>
    %546 = vector.broadcast %545 : vector<1x32xf32> to vector<8x32xf32>
    %547 = arith.mulf %546, %540 : vector<8x32xf32>
    %548 = arith.addf %538, %547 : vector<8x32xf32>
    %c3_249 = arith.constant 3 : index
    %c3_250 = arith.constant 3 : index
    %c0_251 = arith.constant 0 : index
    %c0_252 = arith.constant 0 : index
    %549 = vector.load %arg2[%c3_249, %c3_250, %c0_251, %c0_252] : memref<4x8x8x32xf32, #tpu.memory_space<vmem>>, vector<1x1x8x32xf32>
    %550 = vector.shape_cast %549 : vector<1x1x8x32xf32> to vector<8x32xf32>
    %551 = vector.extract_strided_slice %51 {offsets = [3, 0], sizes = [1, 32], strides = [1, 1]} : vector<8x32xf32> to vector<1x32xf32>
    %552 = vector.broadcast %551 : vector<1x32xf32> to vector<8x32xf32>
    %553 = arith.mulf %552, %550 : vector<8x32xf32>
    %554 = arith.addf %544, %553 : vector<8x32xf32>
    %555 = vector.extract_strided_slice %57 {offsets = [3, 0], sizes = [1, 32], strides = [1, 1]} : vector<8x32xf32> to vector<1x32xf32>
    %556 = vector.broadcast %555 : vector<1x32xf32> to vector<8x32xf32>
    %557 = arith.mulf %556, %550 : vector<8x32xf32>
    %558 = arith.addf %548, %557 : vector<8x32xf32>
    %c3_253 = arith.constant 3 : index
    %c4_254 = arith.constant 4 : index
    %c0_255 = arith.constant 0 : index
    %c0_256 = arith.constant 0 : index
    %559 = vector.load %arg2[%c3_253, %c4_254, %c0_255, %c0_256] : memref<4x8x8x32xf32, #tpu.memory_space<vmem>>, vector<1x1x8x32xf32>
    %560 = vector.shape_cast %559 : vector<1x1x8x32xf32> to vector<8x32xf32>
    %561 = vector.extract_strided_slice %51 {offsets = [4, 0], sizes = [1, 32], strides = [1, 1]} : vector<8x32xf32> to vector<1x32xf32>
    %562 = vector.broadcast %561 : vector<1x32xf32> to vector<8x32xf32>
    %563 = arith.mulf %562, %560 : vector<8x32xf32>
    %564 = arith.addf %554, %563 : vector<8x32xf32>
    %565 = vector.extract_strided_slice %57 {offsets = [4, 0], sizes = [1, 32], strides = [1, 1]} : vector<8x32xf32> to vector<1x32xf32>
    %566 = vector.broadcast %565 : vector<1x32xf32> to vector<8x32xf32>
    %567 = arith.mulf %566, %560 : vector<8x32xf32>
    %568 = arith.addf %558, %567 : vector<8x32xf32>
    %c3_257 = arith.constant 3 : index
    %c5_258 = arith.constant 5 : index
    %c0_259 = arith.constant 0 : index
    %c0_260 = arith.constant 0 : index
    %569 = vector.load %arg2[%c3_257, %c5_258, %c0_259, %c0_260] : memref<4x8x8x32xf32, #tpu.memory_space<vmem>>, vector<1x1x8x32xf32>
    %570 = vector.shape_cast %569 : vector<1x1x8x32xf32> to vector<8x32xf32>
    %571 = vector.extract_strided_slice %51 {offsets = [5, 0], sizes = [1, 32], strides = [1, 1]} : vector<8x32xf32> to vector<1x32xf32>
    %572 = vector.broadcast %571 : vector<1x32xf32> to vector<8x32xf32>
    %573 = arith.mulf %572, %570 : vector<8x32xf32>
    %574 = arith.addf %564, %573 : vector<8x32xf32>
    %575 = vector.extract_strided_slice %57 {offsets = [5, 0], sizes = [1, 32], strides = [1, 1]} : vector<8x32xf32> to vector<1x32xf32>
    %576 = vector.broadcast %575 : vector<1x32xf32> to vector<8x32xf32>
    %577 = arith.mulf %576, %570 : vector<8x32xf32>
    %578 = arith.addf %568, %577 : vector<8x32xf32>
    %c3_261 = arith.constant 3 : index
    %c6_262 = arith.constant 6 : index
    %c0_263 = arith.constant 0 : index
    %c0_264 = arith.constant 0 : index
    %579 = vector.load %arg2[%c3_261, %c6_262, %c0_263, %c0_264] : memref<4x8x8x32xf32, #tpu.memory_space<vmem>>, vector<1x1x8x32xf32>
    %580 = vector.shape_cast %579 : vector<1x1x8x32xf32> to vector<8x32xf32>
    %581 = vector.extract_strided_slice %51 {offsets = [6, 0], sizes = [1, 32], strides = [1, 1]} : vector<8x32xf32> to vector<1x32xf32>
    %582 = vector.broadcast %581 : vector<1x32xf32> to vector<8x32xf32>
    %583 = arith.mulf %582, %580 : vector<8x32xf32>
    %584 = arith.addf %574, %583 : vector<8x32xf32>
    %585 = vector.extract_strided_slice %57 {offsets = [6, 0], sizes = [1, 32], strides = [1, 1]} : vector<8x32xf32> to vector<1x32xf32>
    %586 = vector.broadcast %585 : vector<1x32xf32> to vector<8x32xf32>
    %587 = arith.mulf %586, %580 : vector<8x32xf32>
    %588 = arith.addf %578, %587 : vector<8x32xf32>
    %c3_265 = arith.constant 3 : index
    %c7_266 = arith.constant 7 : index
    %c0_267 = arith.constant 0 : index
    %c0_268 = arith.constant 0 : index
    %589 = vector.load %arg2[%c3_265, %c7_266, %c0_267, %c0_268] : memref<4x8x8x32xf32, #tpu.memory_space<vmem>>, vector<1x1x8x32xf32>
    %590 = vector.shape_cast %589 : vector<1x1x8x32xf32> to vector<8x32xf32>
    %591 = vector.extract_strided_slice %51 {offsets = [7, 0], sizes = [1, 32], strides = [1, 1]} : vector<8x32xf32> to vector<1x32xf32>
    %592 = vector.broadcast %591 : vector<1x32xf32> to vector<8x32xf32>
    %593 = arith.mulf %592, %590 : vector<8x32xf32>
    %594 = arith.addf %584, %593 : vector<8x32xf32>
    %595 = vector.extract_strided_slice %57 {offsets = [7, 0], sizes = [1, 32], strides = [1, 1]} : vector<8x32xf32> to vector<1x32xf32>
    %596 = vector.broadcast %595 : vector<1x32xf32> to vector<8x32xf32>
    %597 = arith.mulf %596, %590 : vector<8x32xf32>
    %598 = arith.addf %588, %597 : vector<8x32xf32>
    %cst_269 = arith.constant 0.000000e+00 : f32
    %599 = vector.broadcast %cst_269 : f32 to vector<8x32xf32>
    %600 = arith.maximumf %594, %599 : vector<8x32xf32>
    %cst_270 = arith.constant 0.000000e+00 : f32
    %601 = vector.broadcast %cst_270 : f32 to vector<8x32xf32>
    %602 = arith.maximumf %598, %601 : vector<8x32xf32>
    %603 = arith.addf %600, %602 : vector<8x32xf32>
    %cst_271 = arith.constant 0.000000e+00 : f32
    %604 = vector.broadcast %cst_271 : f32 to vector<8x32xf32>
    %605 = vector.extract_strided_slice %603 {offsets = [0, 0], sizes = [1, 32], strides = [1, 1]} : vector<8x32xf32> to vector<1x32xf32>
    %c3_272 = arith.constant 3 : index
    %c0_273 = arith.constant 0 : index
    %c0_274 = arith.constant 0 : index
    %c0_275 = arith.constant 0 : index
    %606 = vector.load %arg3[%c3_272, %c0_273, %c0_274, %c0_275] : memref<4x8x8x32xf32, #tpu.memory_space<vmem>>, vector<1x1x8x32xf32>
    %607 = vector.shape_cast %606 : vector<1x1x8x32xf32> to vector<8x32xf32>
    %608 = vector.broadcast %605 : vector<1x32xf32> to vector<8x32xf32>
    %609 = arith.mulf %608, %607 : vector<8x32xf32>
    %610 = arith.addf %604, %609 : vector<8x32xf32>
    %611 = vector.extract_strided_slice %603 {offsets = [1, 0], sizes = [1, 32], strides = [1, 1]} : vector<8x32xf32> to vector<1x32xf32>
    %c3_276 = arith.constant 3 : index
    %c1_277 = arith.constant 1 : index
    %c0_278 = arith.constant 0 : index
    %c0_279 = arith.constant 0 : index
    %612 = vector.load %arg3[%c3_276, %c1_277, %c0_278, %c0_279] : memref<4x8x8x32xf32, #tpu.memory_space<vmem>>, vector<1x1x8x32xf32>
    %613 = vector.shape_cast %612 : vector<1x1x8x32xf32> to vector<8x32xf32>
    %614 = vector.broadcast %611 : vector<1x32xf32> to vector<8x32xf32>
    %615 = arith.mulf %614, %613 : vector<8x32xf32>
    %616 = arith.addf %610, %615 : vector<8x32xf32>
    %617 = vector.extract_strided_slice %603 {offsets = [2, 0], sizes = [1, 32], strides = [1, 1]} : vector<8x32xf32> to vector<1x32xf32>
    %c3_280 = arith.constant 3 : index
    %c2_281 = arith.constant 2 : index
    %c0_282 = arith.constant 0 : index
    %c0_283 = arith.constant 0 : index
    %618 = vector.load %arg3[%c3_280, %c2_281, %c0_282, %c0_283] : memref<4x8x8x32xf32, #tpu.memory_space<vmem>>, vector<1x1x8x32xf32>
    %619 = vector.shape_cast %618 : vector<1x1x8x32xf32> to vector<8x32xf32>
    %620 = vector.broadcast %617 : vector<1x32xf32> to vector<8x32xf32>
    %621 = arith.mulf %620, %619 : vector<8x32xf32>
    %622 = arith.addf %616, %621 : vector<8x32xf32>
    %623 = vector.extract_strided_slice %603 {offsets = [3, 0], sizes = [1, 32], strides = [1, 1]} : vector<8x32xf32> to vector<1x32xf32>
    %c3_284 = arith.constant 3 : index
    %c3_285 = arith.constant 3 : index
    %c0_286 = arith.constant 0 : index
    %c0_287 = arith.constant 0 : index
    %624 = vector.load %arg3[%c3_284, %c3_285, %c0_286, %c0_287] : memref<4x8x8x32xf32, #tpu.memory_space<vmem>>, vector<1x1x8x32xf32>
    %625 = vector.shape_cast %624 : vector<1x1x8x32xf32> to vector<8x32xf32>
    %626 = vector.broadcast %623 : vector<1x32xf32> to vector<8x32xf32>
    %627 = arith.mulf %626, %625 : vector<8x32xf32>
    %628 = arith.addf %622, %627 : vector<8x32xf32>
    %629 = vector.extract_strided_slice %603 {offsets = [4, 0], sizes = [1, 32], strides = [1, 1]} : vector<8x32xf32> to vector<1x32xf32>
    %c3_288 = arith.constant 3 : index
    %c4_289 = arith.constant 4 : index
    %c0_290 = arith.constant 0 : index
    %c0_291 = arith.constant 0 : index
    %630 = vector.load %arg3[%c3_288, %c4_289, %c0_290, %c0_291] : memref<4x8x8x32xf32, #tpu.memory_space<vmem>>, vector<1x1x8x32xf32>
    %631 = vector.shape_cast %630 : vector<1x1x8x32xf32> to vector<8x32xf32>
    %632 = vector.broadcast %629 : vector<1x32xf32> to vector<8x32xf32>
    %633 = arith.mulf %632, %631 : vector<8x32xf32>
    %634 = arith.addf %628, %633 : vector<8x32xf32>
    %635 = vector.extract_strided_slice %603 {offsets = [5, 0], sizes = [1, 32], strides = [1, 1]} : vector<8x32xf32> to vector<1x32xf32>
    %c3_292 = arith.constant 3 : index
    %c5_293 = arith.constant 5 : index
    %c0_294 = arith.constant 0 : index
    %c0_295 = arith.constant 0 : index
    %636 = vector.load %arg3[%c3_292, %c5_293, %c0_294, %c0_295] : memref<4x8x8x32xf32, #tpu.memory_space<vmem>>, vector<1x1x8x32xf32>
    %637 = vector.shape_cast %636 : vector<1x1x8x32xf32> to vector<8x32xf32>
    %638 = vector.broadcast %635 : vector<1x32xf32> to vector<8x32xf32>
    %639 = arith.mulf %638, %637 : vector<8x32xf32>
    %640 = arith.addf %634, %639 : vector<8x32xf32>
    %641 = vector.extract_strided_slice %603 {offsets = [6, 0], sizes = [1, 32], strides = [1, 1]} : vector<8x32xf32> to vector<1x32xf32>
    %c3_296 = arith.constant 3 : index
    %c6_297 = arith.constant 6 : index
    %c0_298 = arith.constant 0 : index
    %c0_299 = arith.constant 0 : index
    %642 = vector.load %arg3[%c3_296, %c6_297, %c0_298, %c0_299] : memref<4x8x8x32xf32, #tpu.memory_space<vmem>>, vector<1x1x8x32xf32>
    %643 = vector.shape_cast %642 : vector<1x1x8x32xf32> to vector<8x32xf32>
    %644 = vector.broadcast %641 : vector<1x32xf32> to vector<8x32xf32>
    %645 = arith.mulf %644, %643 : vector<8x32xf32>
    %646 = arith.addf %640, %645 : vector<8x32xf32>
    %647 = vector.extract_strided_slice %603 {offsets = [7, 0], sizes = [1, 32], strides = [1, 1]} : vector<8x32xf32> to vector<1x32xf32>
    %c3_300 = arith.constant 3 : index
    %c7_301 = arith.constant 7 : index
    %c0_302 = arith.constant 0 : index
    %c0_303 = arith.constant 0 : index
    %648 = vector.load %arg3[%c3_300, %c7_301, %c0_302, %c0_303] : memref<4x8x8x32xf32, #tpu.memory_space<vmem>>, vector<1x1x8x32xf32>
    %649 = vector.shape_cast %648 : vector<1x1x8x32xf32> to vector<8x32xf32>
    %650 = vector.broadcast %647 : vector<1x32xf32> to vector<8x32xf32>
    %651 = arith.mulf %650, %649 : vector<8x32xf32>
    %652 = arith.addf %646, %651 : vector<8x32xf32>
    %653 = math.absf %652 : vector<8x32xf32>
    %cst_304 = arith.constant 0.000000e+00 : f32
    %654 = vector.broadcast %cst_304 : f32 to vector<8x32xf32>
    %655 = arith.subf %654, %653 : vector<8x32xf32>
    %656 = math.exp %655 : vector<8x32xf32>
    %cst_305 = arith.constant 0.000000e+00 : f32
    %657 = vector.broadcast %cst_305 : f32 to vector<8x32xf32>
    %658 = arith.cmpf oge, %652, %657 : vector<8x32xf32>
    %cst_306 = arith.constant 1.000000e+00 : f32
    %659 = vector.broadcast %cst_306 : f32 to vector<8x32xf32>
    %660 = arith.addf %659, %656 : vector<8x32xf32>
    %cst_307 = arith.constant 1.000000e+00 : f32
    %661 = vector.broadcast %cst_307 : f32 to vector<8x32xf32>
    %662 = arith.divf %661, %660 : vector<8x32xf32>
    %cst_308 = arith.constant 1.000000e+00 : f32
    %663 = vector.broadcast %cst_308 : f32 to vector<8x32xf32>
    %664 = arith.addf %663, %656 : vector<8x32xf32>
    %665 = arith.divf %656, %664 : vector<8x32xf32>
    %666 = arith.select %658, %662, %665 : vector<8x32xi1>, vector<8x32xf32>
    %c3_309 = arith.constant 3 : index
    %c0_310 = arith.constant 0 : index
    %c0_311 = arith.constant 0 : index
    %667 = vector.load %arg4[%c3_309, %c0_310, %c0_311] : memref<4x8x32xf32, #tpu.memory_space<vmem>>, vector<1x8x32xf32>
    %668 = vector.shape_cast %667 : vector<1x8x32xf32> to vector<8x32xf32>
    %669 = vector.shape_cast %666 : vector<8x32xf32> to vector<1x8x32xf32>
    tpu.vector_store %arg4[%c3_309, %c0_310, %c0_311], %669 {strides = array<i32>} : memref<4x8x32xf32, #tpu.memory_space<vmem>>, vector<1x8x32xf32>,
    return
  }
  func.func @transform_0(%arg0: i32) -> (i32, i32, i32) {
    %c0_i32 = arith.constant 0 : i32
    %c0_i32_0 = arith.constant 0 : i32
    %c0_i32_1 = arith.constant 0 : i32
    %c0_i32_2 = arith.constant 0 : i32
    return %c0_i32, %c0_i32_0, %c0_i32_1 : i32, i32, i32
  }
  func.func @transform_1(%arg0: i32) -> (i32, i32, i32, i32) {
    %c0_i32 = arith.constant 0 : i32
    %c0_i32_0 = arith.constant 0 : i32
    %c0_i32_1 = arith.constant 0 : i32
    %c0_i32_2 = arith.constant 0 : i32
    %c0_i32_3 = arith.constant 0 : i32
    return %c0_i32, %c0_i32_0, %c0_i32_1, %c0_i32_2 : i32, i32, i32, i32
  }
  func.func @transform_2(%arg0: i32) -> (i32, i32, i32, i32) {
    %c0_i32 = arith.constant 0 : i32
    %c0_i32_0 = arith.constant 0 : i32
    %c0_i32_1 = arith.constant 0 : i32
    %c0_i32_2 = arith.constant 0 : i32
    %c0_i32_3 = arith.constant 0 : i32
    return %c0_i32, %c0_i32_0, %c0_i32_1, %c0_i32_2 : i32, i32, i32, i32
  }
  func.func @transform_3(%arg0: i32) -> (i32, i32, i32) {
    %c0_i32 = arith.constant 0 : i32
    %c0_i32_0 = arith.constant 0 : i32
    %c0_i32_1 = arith.constant 0 : i32
    %c0_i32_2 = arith.constant 0 : i32
    return %c0_i32, %c0_i32_0, %c0_i32_1 : i32, i32, i32
  }
}

</mosaic_0001>

<bundles_post_ra>
// kernel: forward.1
= control target key start
LH: loop header
LB: loop body
LE: loop exit
PB: predicated region body
PF: predicated region fallthrough
CT: control target
= control target key end

     0   :  { %vm46_vm0 = vcmask 1043456   ;;  %vm179_vm1 = vcmask 1041409   ;;  %vm181_vm2 = vcmask 1042434   ;;  %vm183_vm3 = vcmask 1043459   ;;  %s1834_s0 = inlined_call_operand.vmem [shape: f32[8,4,256], index: 0, kind: input, shape index: {}]   ;;  %s1835_s1 = inlined_call_operand.vmem [shape: f32[4,8,8,32], index: 1, kind: input, shape index: {}]   ;;  %s1836_s2 = inlined_call_operand.vmem [shape: f32[4,8,8,32], index: 2, kind: input, shape index: {}]   ;;  %s1837_s3 = inlined_call_operand.vmem [shape: f32[4,8,32], index: 3, kind: output, shape index: {}]  }
   0x1   :  { %v16_v0 = vld [vmem:[%s1834_s0 + $0x10] sm:$0xff]  ;;  %v14_v1 = vld [vmem:[%s1834_s0] sm:$0xff]  ;;  %v17_v2 = vld [vmem:[%s1834_s0 + $0x18] sm:$0xff]  ;;  %vm185_vm4 = vcmask 1044484   ;;  %vm187_vm5 = vcmask 1045509   ;;  %vm189_vm6 = vcmask 1046534  }
   0x2   :  { %v32_v3 = vcombine.high %v16_v0, %v16_v0  ;;  %v57_v4 = vsel %vm46_vm0, %v16_v0, 0.0  ;;  %v30_v5 = vcombine.high %v14_v1, %v14_v1  ;;  %v47_v6 = vsel %vm46_vm0, %v14_v1, 0.0  ;;  %v15_v7 = vld [vmem:[%s1834_s0 + $0x8] sm:$0xff]  ;;  %v18_v18 = vld [vmem:[%s1834_s0 + $0x20] sm:$0xff]  ;;  %v20_v34 = vld [vmem:[%s1834_s0 + $0x30] sm:$0xff] }
   0x3   :  { %v33_v8 = vcombine.high %v17_v2, %v17_v2  ;;  %v31_v9 = vcombine.high %v15_v7, %v15_v7  ;;  %v62_v12 = vsel %vm46_vm0, %v17_v2, 0.0  ;;  %v52_v13 = vsel %vm46_vm0, %v15_v7, 0.0  ;;  %v19_v26 = vld [vmem:[%s1834_s0 + $0x28] sm:$0xff]  ;;  %v21_v42 = vld [vmem:[%s1834_s0 + $0x38] sm:$0xff] }
   0x4   :  { %v58_v10 = vsel %vm46_vm0, %v32_v3, 0.0  ;;  %v48_v11 = vsel %vm46_vm0, %v30_v5, 0.0  ;;  %v100_v21 = vsel %vm46_vm0, %v15_v7, -inf  ;;  %v95_v23 = vsel %vm46_vm0, %v14_v1, -inf }
   0x5   :  { %v59_v14 = vadd.f32 %v58_v10, %v57_v4  ;;  %v49_v15 = vadd.f32 %v48_v11, %v47_v6  ;;  %v63_v16 = vsel %vm46_vm0, %v33_v8, 0.0  ;;  %v53_v17 = vsel %vm46_vm0, %v31_v9, 0.0 }
   0x6   :  { %v64_v19 = vadd.f32 %v63_v16, %v62_v12  ;;  %v54_v20 = vadd.f32 %v53_v17, %v52_v13  ;;  %v101_v22 = vsel %vm46_vm0, %v31_v9, -inf  ;;  %v96_v24 = vsel %vm46_vm0, %v30_v5, -inf }
   0x7   :  { %60 = vadd.xlane.f32.xlu1 %v59_v14  ;;  %50 = vadd.xlane.f32.xlu0 %v49_v15  ;;  %v34_v25 = vcombine.high %v18_v18, %v18_v18  ;;  %v102_v27 = vmax.f32 %v100_v21, %v101_v22  ;;  %v97_v28 = vmax.f32 %v95_v23, %v96_v24  ;;  %v105_v29 = vsel %vm46_vm0, %v16_v0, -inf }
   0x8   :  { %v106_v30 = vsel %vm46_vm0, %v32_v3, -inf  ;;  %v67_v31 = vsel %vm46_vm0, %v18_v18, 0.0  ;;  %v35_v33 = vcombine.high %v19_v26, %v19_v26  ;;  %v110_v37 = vsel %vm46_vm0, %v17_v2, -inf }
   0x9   :  { %v68_v32 = vsel %vm46_vm0, %v34_v25, 0.0  ;;  %v107_v35 = vmax.f32 %v105_v29, %v106_v30  ;;  %v111_v38 = vsel %vm46_vm0, %v33_v8, -inf  ;;  %v72_v39 = vsel %vm46_vm0, %v19_v26, 0.0 }
   0xa   :  { %v69_v36 = vadd.f32 %v68_v32, %v67_v31  ;;  %v73_v40 = vsel %vm46_vm0, %v35_v33, 0.0  ;;  %v36_v41 = vcombine.high %v20_v34, %v20_v34  ;;  %v112_v43 = vmax.f32 %v110_v37, %v111_v38 }
   0xb   :  { %65 = vadd.xlane.f32.xlu1 %v64_v19  ;;  %55 = vadd.xlane.f32.xlu0 %v54_v20  ;;  %v74_v44 = vadd.f32 %v73_v40, %v72_v39  ;;  %v115_v45 = vsel %vm46_vm0, %v18_v18, -inf  ;;  %v116_v46 = vsel %vm46_vm0, %v34_v25, -inf  ;;  %v77_v47 = vsel %vm46_vm0, %v20_v34, 0.0 }
   0xc   :  { %v78_v48 = vsel %vm46_vm0, %v36_v41, 0.0  ;;  %v37_v49 = vcombine.high %v21_v42, %v21_v42  ;;  %v117_v50 = vmax.f32 %v115_v45, %v116_v46  ;;  %v120_v52 = vsel %vm46_vm0, %v19_v26, -inf }
   0xd   :  { %v79_v51 = vadd.f32 %v78_v48, %v77_v47  ;;  %v121_v53 = vsel %vm46_vm0, %v35_v33, -inf  ;;  %v82_v54 = vsel %vm46_vm0, %v21_v42, 0.0  ;;  %v125_v58 = vsel %vm46_vm0, %v20_v34, -inf }
   0xe   :  { %v83_v55 = vsel %vm46_vm0, %v37_v49, 0.0  ;;  %v122_v56 = vmax.f32 %v120_v52, %v121_v53  ;;  %v126_v59 = vsel %vm46_vm0, %v36_v41, -inf  ;;  %v130_v60 = vsel %vm46_vm0, %v21_v42, -inf }
   0xf   :  { %103 = vmax.xlane.f32.xlu1 %v102_v27  ;;  %98 = vmax.xlane.f32.xlu0 %v97_v28  ;;  %v84_v57 = vadd.f32 %v83_v55, %v82_v54  ;;  %v131_v61 = vsel %vm46_vm0, %v37_v49, -inf  ;;  %v127_v62 = vmax.f32 %v125_v58, %v126_v59  ;;  %v135_v0 = vlaneseq }
  0x10   :  { %v132_v63 = vmax.f32 %v130_v60, %v131_v61  ;;  %vm191_vm7 = vcmask 1047559   ;;  %vm728_vm12 = vcmask 261120  }
  0x11   :  { %v1280_v1 = vshrl.u32 %v135_v0, 7  ;;  %v136_v5 = vand.u32 127, %v135_v0 }
  0x13   :  { %108 = vmax.xlane.f32.xlu1 %v107_v35  ;;  %70 = vadd.xlane.f32.xlu0 %v69_v36  ;;  %v1283_v4 = vsub.s32 0, %v1280_v1  ;;  %v1286_v6 = vsub.s32 1, %v1280_v1  ;;  %v1289_v7 = vsub.s32 2, %v1280_v1  ;;  %v1292_v8 = vsub.s32 3, %v1280_v1 }
  0x14   :  { %v1296_v15 = vand.u32 3, %v136_v5 }
  0x16   :  { %vm138_vm8 = vcmp.eq.s32.totalorder %v1296_v15, 0  ;;  %vm244_vm9 = vcmp.eq.s32.totalorder %v1296_v15, 1  ;;  %vm343_vm10 = vcmp.eq.s32.totalorder %v1296_v15, 2  ;;  %vm442_vm11 = vcmp.eq.s32.totalorder %v1296_v15, 3 }
  0x17   :  { %113 = vmax.xlane.f32.xlu1 %v112_v43  ;;  %75 = vadd.xlane.f32.xlu0 %v74_v44 }
  0x1b   :  { %118 = vmax.xlane.f32.xlu1 %v117_v50  ;;  %80 = vadd.xlane.f32.xlu0 %v79_v51 }
  0x1f   :  { %123 = vmax.xlane.f32.xlu1 %v122_v56  ;;  %85 = vadd.xlane.f32.xlu0 %v84_v57 }
  0x23   :  { %128 = vmax.xlane.f32.xlu0 %v127_v62  ;;  %133 = vmax.xlane.f32.xlu1 %v132_v63 }
  0x90   :  { %v61_v2 = vpop.xlane.xlu1 %60  ;;  %v51_v3 = vpop.xlane.xlu0 %50 }
  0x91   :  { %v89_v9 = vmul.f32 0.00390625, %v61_v2  ;;  %v87_v10 = vmul.f32 0.00390625, %v51_v3 }
  0x93   :  { %v150_v16 = vrot.slane %v89_v9, %v1283_v4  ;;  %v256_v17 = vrot.slane %v89_v9, %v1286_v6  ;;  %v355_v18 = vrot.slane %v89_v9, %v1289_v7  ;;  %v454_v19 = vrot.slane %v89_v9, %v1292_v8 }
  0x94   :  { %v66_v11 = vpop.xlane.xlu1 %65  ;;  %v56_v12 = vpop.xlane.xlu0 %55  ;;  %v142_v20 = vrot.slane %v87_v10, %v1283_v4  ;;  %v248_v21 = vrot.slane %v87_v10, %v1286_v6  ;;  %v347_v22 = vrot.slane %v87_v10, %v1289_v7  ;;  %v446_v23 = vrot.slane %v87_v10, %v1292_v8 }
  0x95   :  { %v1294_v13 = vmul.f32 0.00390625, %v66_v11  ;;  %v88_v14 = vmul.f32 0.00390625, %v56_v12 }
  0x97   :  { %v146_v24 = vrot.slane %v88_v14, %v1283_v4  ;;  %v252_v25 = vrot.slane %v88_v14, %v1286_v6  ;;  %v351_v26 = vrot.slane %v88_v14, %v1289_v7  ;;  %v450_v27 = vrot.slane %v88_v14, %v1292_v8 }
  0x98   :  { %v104_v28 = vpop.xlane.xlu1 %103  ;;  %v99_v29 = vpop.xlane.xlu0 %98  ;;  %v154_v30 = vrot.slane %v1294_v13, %v1283_v4  ;;  %v260_v31 = vrot.slane %v1294_v13, %v1286_v6  ;;  %v359_v32 = vrot.slane %v1294_v13, %v1289_v7  ;;  %v458_v33 = vrot.slane %v1294_v13, %v1292_v8 }
  0x99   :  { %v202_v34 = vrot.slane %v104_v28, %v1283_v4  ;;  %v301_v35 = vrot.slane %v104_v28, %v1286_v6  ;;  %v400_v36 = vrot.slane %v104_v28, %v1289_v7  ;;  %v499_v37 = vrot.slane %v104_v28, %v1292_v8 }
  0x9a   :  { %v180_v38 = vsel %vm179_vm1, %v146_v24, %v142_v20  ;;  %v285_v39 = vsel %vm179_vm1, %v252_v25, %v248_v21  ;;  %v384_v40 = vsel %vm179_vm1, %v351_v26, %v347_v22  ;;  %v483_v41 = vsel %vm179_vm1, %v450_v27, %v446_v23 }
  0x9b   :  { %v198_v42 = vrot.slane %v99_v29, %v1283_v4  ;;  %v297_v43 = vrot.slane %v99_v29, %v1286_v6  ;;  %v396_v44 = vrot.slane %v99_v29, %v1289_v7  ;;  %v495_v45 = vrot.slane %v99_v29, %v1292_v8 }
  0x9c   :  { %v109_v46 = vpop.xlane.xlu1 %108  ;;  %v71_v47 = vpop.xlane.xlu0 %70  ;;  %v182_v52 = vsel %vm181_vm2, %v150_v16, %v180_v38  ;;  %v286_v53 = vsel %vm181_vm2, %v256_v17, %v285_v39  ;;  %v385_v54 = vsel %vm181_vm2, %v355_v18, %v384_v40  ;;  %v484_v55 = vsel %vm181_vm2, %v454_v19, %v483_v41 }
  0x9d   :  { %v206_v48 = vrot.slane %v109_v46, %v1283_v4  ;;  %v305_v49 = vrot.slane %v109_v46, %v1286_v6  ;;  %v404_v50 = vrot.slane %v109_v46, %v1289_v7  ;;  %v503_v51 = vrot.slane %v109_v46, %v1292_v8 }
  0x9e   :  { %v235_v56 = vsel %vm179_vm1, %v202_v34, %v198_v42  ;;  %v334_v57 = vsel %vm179_vm1, %v301_v35, %v297_v43  ;;  %v433_v58 = vsel %vm179_vm1, %v400_v36, %v396_v44  ;;  %v532_v59 = vsel %vm179_vm1, %v499_v37, %v495_v45 }
  0x9f   :  { %v236_v60 = vsel %vm181_vm2, %v206_v48, %v235_v56  ;;  %v335_v61 = vsel %vm181_vm2, %v305_v49, %v334_v57  ;;  %v434_v62 = vsel %vm181_vm2, %v404_v50, %v433_v58  ;;  %v533_v63 = vsel %vm181_vm2, %v503_v51, %v532_v59 }
  0xa0   :  { %v114_v0 = vpop.xlane.xlu1 %113  ;;  %v76_v2 = vpop.xlane.xlu0 %75  ;;  %v91_v3 = vmul.f32 0.00390625, %v71_v47  ;;  %v184_v11 = vsel %vm183_vm3, %v154_v30, %v182_v52  ;;  %v287_v12 = vsel %vm183_vm3, %v260_v31, %v286_v53  ;;  %v386_v16 = vsel %vm183_vm3, %v359_v32, %v385_v54 }
  0xa1   :  { %v210_v5 = vrot.slane %v114_v0, %v1283_v4  ;;  %v309_v9 = vrot.slane %v114_v0, %v1286_v6  ;;  %v408_v10 = vrot.slane %v114_v0, %v1289_v7  ;;  %v507_v13 = vrot.slane %v114_v0, %v1292_v8 }
  0xa2   :  { %v92_v14 = vmul.f32 0.00390625, %v76_v2  ;;  %v485_v17 = vsel %vm183_vm3, %v458_v33, %v484_v55  ;;  %v158_v18 = vrot.slane %v91_v3, %v1283_v4  ;;  %v264_v19 = vrot.slane %v91_v3, %v1286_v6 }
  0xa3   :  { %v363_v20 = vrot.slane %v91_v3, %v1289_v7  ;;  %v462_v21 = vrot.slane %v91_v3, %v1292_v8  ;;  %v237_v22 = vsel %vm183_vm3, %v210_v5, %v236_v60  ;;  %v336_v23 = vsel %vm183_vm3, %v309_v9, %v335_v61 }
  0xa4   :  { %v119_v24 = vpop.xlane.xlu1 %118  ;;  %v81_v25 = vpop.xlane.xlu0 %80  ;;  %v186_v26 = vsel %vm185_vm4, %v158_v18, %v184_v11  ;;  %v288_v27 = vsel %vm185_vm4, %v264_v19, %v287_v12  ;;  %v435_v28 = vsel %vm183_vm3, %v408_v10, %v434_v62  ;;  %v534_v29 = vsel %vm183_vm3, %v507_v13, %v533_v63 }
  0xa5   :  { %v162_v30 = vrot.slane %v92_v14, %v1283_v4  ;;  %v268_v31 = vrot.slane %v92_v14, %v1286_v6  ;;  %v367_v32 = vrot.slane %v92_v14, %v1289_v7  ;;  %v466_v33 = vrot.slane %v92_v14, %v1292_v8 }
  0xa6   :  { %v214_v34 = vrot.slane %v119_v24, %v1283_v4  ;;  %v313_v35 = vrot.slane %v119_v24, %v1286_v6  ;;  %v412_v36 = vrot.slane %v119_v24, %v1289_v7  ;;  %v511_v37 = vrot.slane %v119_v24, %v1292_v8 }
  0xa7   :  { %v387_v38 = vsel %vm185_vm4, %v363_v20, %v386_v16  ;;  %v486_v39 = vsel %vm185_vm4, %v462_v21, %v485_v17  ;;  %v188_v40 = vsel %vm187_vm5, %v162_v30, %v186_v26  ;;  %v289_v41 = vsel %vm187_vm5, %v268_v31, %v288_v27 }
  0xa8   :  { %v124_v42 = vpop.xlane.xlu1 %123  ;;  %v86_v43 = vpop.xlane.xlu0 %85  ;;  %v388_v44 = vsel %vm187_vm5, %v367_v32, %v387_v38  ;;  %v487_v45 = vsel %vm187_vm5, %v466_v33, %v486_v39  ;;  %v238_v46 = vsel %vm185_vm4, %v214_v34, %v237_v22  ;;  %v337_v47 = vsel %vm185_vm4, %v313_v35, %v336_v23 }
  0xa9   :  { %v436_v48 = vsel %vm185_vm4, %v412_v36, %v435_v28  ;;  %v535_v49 = vsel %vm185_vm4, %v511_v37, %v534_v29  ;;  %v93_v50 = vmul.f32 0.00390625, %v81_v25  ;;  %v218_v51 = vrot.slane %v124_v42, %v1283_v4  ;;  %v541_v36 = vld [vmem:[%s1835_s1] sm:$0xff]  ;;  %v1115_v37 = vld [vmem:[%s1835_s1 + $0x8] sm:$0xff] }
  0xaa   :  { %v317_v52 = vrot.slane %v124_v42, %v1286_v6  ;;  %v416_v53 = vrot.slane %v124_v42, %v1289_v7  ;;  %v515_v54 = vrot.slane %v124_v42, %v1292_v8  ;;  %v94_v55 = vmul.f32 0.00390625, %v86_v43 }
  0xab   :  { %v166_v56 = vrot.slane %v93_v50, %v1283_v4  ;;  %v272_v57 = vrot.slane %v93_v50, %v1286_v6  ;;  %v371_v58 = vrot.slane %v93_v50, %v1289_v7  ;;  %v470_v59 = vrot.slane %v93_v50, %v1292_v8 }
  0xac   :  { %v170_v60 = vrot.slane %v94_v55, %v1283_v4  ;;  %v276_v61 = vrot.slane %v94_v55, %v1286_v6  ;;  %v375_v62 = vrot.slane %v94_v55, %v1289_v7  ;;  %v474_v63 = vrot.slane %v94_v55, %v1292_v8  ;;  %v129_v0 = vpop.xlane.xlu0 %128  ;;  %v134_v14 = vpop.xlane.xlu1 %133  ;;  %v1117_v55 = vld [vmem:[%s1835_s1 + $0x18] sm:$0xff] }
  0xad   :  { %v190_v2 = vsel %vm189_vm6, %v166_v56, %v188_v40  ;;  %v290_v3 = vsel %vm189_vm6, %v272_v57, %v289_v41  ;;  %v389_v5 = vsel %vm189_vm6, %v371_v58, %v388_v44  ;;  %v488_v9 = vsel %vm189_vm6, %v470_v59, %v487_v45 }
  0xae   :  { %v291_v10 = vsel %vm191_vm7, %v276_v61, %v290_v3  ;;  %v390_v11 = vsel %vm191_vm7, %v375_v62, %v389_v5  ;;  %v489_v12 = vsel %vm191_vm7, %v474_v63, %v488_v9  ;;  %v239_v13 = vsel %vm187_vm5, %v218_v51, %v238_v46  ;;  %v1116_v46 = vld [vmem:[%s1835_s1 + $0x10] sm:$0xff]  ;;  %v1118_v63 = vld [vmem:[%s1835_s1 + $0x20] sm:$0xff]  ;;  %v1119_v5 = vld [vmem:[%s1835_s1 + $0x28] sm:$0xff] }
  0xaf   :  { %v338_v16 = vsel %vm187_vm5, %v317_v52, %v337_v47  ;;  %v437_v17 = vsel %vm187_vm5, %v416_v53, %v436_v48  ;;  %v536_v18 = vsel %vm187_vm5, %v515_v54, %v535_v49  ;;  %v222_v19 = vrot.slane %v129_v0, %v1283_v4 }
  0xb0   :  { %v321_v20 = vrot.slane %v129_v0, %v1286_v6  ;;  %v420_v21 = vrot.slane %v129_v0, %v1289_v7  ;;  %v519_v22 = vrot.slane %v129_v0, %v1292_v8  ;;  %v192_v23 = vsel %vm191_vm7, %v170_v60, %v190_v2 }
  0xb1   :  { %v240_v24 = vsel %vm189_vm6, %v222_v19, %v239_v13  ;;  %v194_v25 = vsel %vm138_vm8, %v192_v23, 0.0  ;;  %v226_v26 = vrot.slane %v134_v14, %v1283_v4  ;;  %v325_v27 = vrot.slane %v134_v14, %v1286_v6  ;;  %v1129_v13 = vld [vmem:[%s1835_s1 + $0x40] sm:$0xff]  ;;  %v1131_v23 = vld [vmem:[%s1835_s1 + $0x50] sm:$0xff] }
  0xb2   :  { %v339_v28 = vsel %vm189_vm6, %v321_v20, %v338_v16  ;;  %v438_v29 = vsel %vm189_vm6, %v420_v21, %v437_v17  ;;  %v537_v30 = vsel %vm189_vm6, %v519_v22, %v536_v18  ;;  %v293_v31 = vsel %vm244_vm9, %v291_v10, %v194_v25  ;;  %v1120_v22 = vld [vmem:[%s1835_s1 + $0x30] sm:$0xff] }
  0xb3   :  { %v241_v32 = vsel %vm191_vm7, %v226_v26, %v240_v24  ;;  %v340_v33 = vsel %vm191_vm7, %v325_v27, %v339_v28  ;;  %v392_v34 = vsel %vm343_vm10, %v390_v11, %v293_v31  ;;  %v424_v35 = vrot.slane %v134_v14, %v1289_v7 }
  0xb4   :  { %v1436_v38 = vsub.s32 4, %v1280_v1  ;;  %v243_v39 = vsel %vm138_vm8, %v241_v32, 0.0  ;;  %v491_v40 = vsel %vm442_vm11, %v489_v12, %v392_v34  ;;  %v523_v41 = vrot.slane %v134_v14, %v1292_v8  ;;  %v1121_v32 = vld [vmem:[%s1835_s1 + $0x38] sm:$0xff] }
  0xb5   :  { %v342_v42 = vsel %vm244_vm9, %v340_v33, %v243_v39  ;;  %v439_v43 = vsel %vm191_vm7, %v424_v35, %v438_v29  ;;  %v1447_v44 = vrot.slane %v491_v40, %v1283_v4  ;;  %v1450_v45 = vrot.slane %v491_v40, %v1286_v6  ;;  %v1132_v33 = vld [vmem:[%s1835_s1 + $0x58] sm:$0xff] }
  0xb6   :  { %v1456_v47 = vsub.s32 5, %v1280_v1  ;;  %v441_v48 = vsel %vm343_vm10, %v439_v43, %v342_v42  ;;  %v538_v49 = vsel %vm191_vm7, %v523_v41, %v537_v30  ;;  %v1462_v50 = vrot.slane %v491_v40, %v1289_v7  ;;  %v1133_v43 = vld [vmem:[%s1835_s1 + $0x60] sm:$0xff] }
  0xb7   :  { %v540_v51 = vsel %vm442_vm11, %v538_v49, %v441_v48  ;;  %v546_v52 = vmul.f32 %v1447_v44, %v541_v36  ;;  %v560_v53 = vmul.f32 %v1115_v37, %v1450_v45  ;;  %v1469_v54 = vrot.slane %v491_v40, %v1292_v8 }
  0xb8   :  { %v1475_v56 = vsub.s32 6, %v1280_v1  ;;  %v1478_v57 = vrot.slane %v540_v51, %v1283_v4  ;;  %v1481_v15 = vrot.slane %v540_v51, %v1286_v6  ;;  %v1484_v58 = vrot.slane %v540_v51, %v1289_v7 }
  0xb9   :  { %v561_v59 = vadd.f32 %v560_v53, %v546_v52  ;;  %v574_v60 = vmul.f32 %v1116_v46, %v1462_v50  ;;  %v1488_v61 = vrot.slane %v540_v51, %v1292_v8  ;;  %v1491_v62 = vrot.slane %v491_v40, %v1436_v38  ;;  %v1134_v53 = vld [vmem:[%s1835_s1 + $0x68] sm:$0xff] }
  0xba   :  { %v552_v0 = vmul.f32 %v1478_v57, %v541_v36  ;;  %v566_v2 = vmul.f32 %v1115_v37, %v1481_v15  ;;  %v1499_v3 = vrot.slane %v540_v51, %v1436_v38  ;;  %v1505_v9 = vsub.s32 7, %v1280_v1  ;;  %v1130_v1 = vld [vmem:[%s1835_s1 + $0x48] sm:$0xff] }
  0xbb   :  { %v575_v10 = vadd.f32 %v574_v60, %v561_v59  ;;  %v588_v11 = vmul.f32 %v1117_v55, %v1469_v54  ;;  %v1509_v12 = vrot.slane %v491_v40, %v1456_v47  ;;  %v580_v16 = vmul.f32 %v1116_v46, %v1484_v58 }
  0xbc   :  { %v567_v14 = vadd.f32 %v566_v2, %v552_v0  ;;  %v1516_v17 = vrot.slane %v540_v51, %v1456_v47  ;;  %v594_v19 = vmul.f32 %v1117_v55, %v1488_v61  ;;  %v602_v20 = vmul.f32 %v1118_v63, %v1491_v62  ;;  %v1147_v0 = vld [vmem:[%s1835_s1 + $0x88] sm:$0xff] }
  0xbd   :  { %v589_v18 = vadd.f32 %v588_v11, %v575_v10  ;;  %v1524_v21 = vrot.slane %v491_v40, %v1475_v56  ;;  %v608_v25 = vmul.f32 %v1118_v63, %v1499_v3  ;;  %v616_v26 = vmul.f32 %v1119_v5, %v1509_v12  ;;  %v1146_v63 = vld [vmem:[%s1835_s1 + $0x80] sm:$0xff] }
  0xbe   :  { %v581_v24 = vadd.f32 %v580_v16, %v567_v14  ;;  %v1535_v27 = vrot.slane %v540_v51, %v1475_v56  ;;  %v1538_v29 = vrot.slane %v491_v40, %v1505_v9  ;;  %v732_v30 = vmul.f32 %v1129_v13, %v1447_v44 }
  0xbf   :  { %1839 = vst [vmem:[#allocation2_spill] sm:$0xff] %v1524_v21  ;;  %v603_v28 = vadd.f32 %v602_v20, %v589_v18  ;;  %v734_v31 = vmul.f32 %v1129_v13, %v1478_v57  ;;  %v622_v35 = vmul.f32 %v1119_v5, %v1516_v17  ;;  %v738_v36 = vmul.f32 %v1130_v1, %v1450_v45  ;;  %v1135_v18 = vld [vmem:[%s1835_s1 + $0x70] sm:$0xff] }
  0xc0   :  { %v595_v34 = vadd.f32 %v594_v19, %v581_v24  ;;  %v740_v37 = vmul.f32 %v1130_v1, %v1481_v15  ;;  %v630_v40 = vmul.f32 %v1120_v22, %v1524_v21  ;;  %v1553_v41 = vrot.slane %v540_v51, %v1505_v9  ;;  %v1148_v19 = vld [vmem:[%s1835_s1 + $0x90] sm:$0xff] }
  0xc1   :  { %v617_v39 = vadd.f32 %v616_v26, %v603_v28  ;;  %v744_v42 = vmul.f32 %v1131_v23, %v1462_v50  ;;  %v739_v48 = vadd.f32 %v738_v36, %v732_v30  ;;  %v746_v52 = vmul.f32 %v1131_v23, %v1484_v58  ;;  %v1149_v36 = vld [vmem:[%s1835_s1 + $0x98] sm:$0xff] }
  0xc2   :  { %v609_v46 = vadd.f32 %v608_v25, %v595_v34  ;;  %v741_v49 = vadd.f32 %v740_v37, %v734_v31  ;;  %v636_v59 = vmul.f32 %v1120_v22, %v1535_v27  ;;  %v644_v51 = vmul.f32 %v1121_v32, %v1538_v29  ;;  %v1136_v31 = vld [vmem:[%s1835_s1 + $0x78] sm:$0xff] }
  0xc3   :  { %v631_v55 = vadd.f32 %v630_v40, %v617_v39  ;;  %v750_v60 = vmul.f32 %v1132_v33, %v1469_v54  ;;  %v745_v5 = vadd.f32 %v744_v42, %v739_v48  ;;  %v752_v11 = vmul.f32 %v1132_v33, %v1488_v61 }
  0xc4   :  { %v623_v2 = vadd.f32 %v622_v35, %v609_v46  ;;  %v747_v10 = vadd.f32 %v746_v52, %v741_v49  ;;  %v650_v14 = vmul.f32 %v1121_v32, %v1553_v41  ;;  %v756_v16 = vmul.f32 %v1133_v43, %v1491_v62 }
  0xc5   :  { %v645_v13 = vadd.f32 %v644_v51, %v631_v55  ;;  %v758_v1 = vmul.f32 %v1133_v43, %v1499_v3  ;;  %v751_v22 = vadd.f32 %v750_v60, %v745_v5  ;;  %v762_v24 = vmul.f32 %v1134_v53, %v1509_v12  ;;  %v1150_v43 = vld [vmem:[%s1835_s1 + $0xa0] sm:$0xff] }
  0xc6   :  { %v637_v20 = vadd.f32 %v636_v59, %v623_v2  ;;  %v753_v23 = vadd.f32 %v752_v11, %v747_v10  ;;  %v764_v25 = vmul.f32 %v1134_v53, %v1516_v17  ;;  %v859_v26 = vmul.f32 %v1146_v63, %v1447_v44  ;;  %v655_v5 = vld [vmem:[%s1836_s2] sm:$0xff]  ;;  %v1122_v10 = vld [vmem:[%s1836_s2 + $0x8] sm:$0xff] }
  0xc7   :  { %v861_v28 = vmul.f32 %v1146_v63, %v1478_v57  ;;  %v865_v30 = vmul.f32 %v1147_v0, %v1450_v45  ;;  %v757_v33 = vadd.f32 %v756_v16, %v751_v22  ;;  %v867_v35 = vmul.f32 %v1147_v0, %v1481_v15  ;;  %v1151_v11 = vld [vmem:[%s1835_s1 + $0xa8] sm:$0xff] }
  0xc8   :  { %v651_v32 = vadd.f32 %v650_v14, %v637_v20  ;;  %v759_v34 = vadd.f32 %v758_v1, %v753_v23  ;;  %v652_v37 = vmax.f32 %v645_v13, 0.0  ;;  %v768_v39 = vmul.f32 %v1135_v18, %v1524_v21 }
  0xc9   :  { %v866_v40 = vadd.f32 %v865_v30, %v859_v26  ;;  %v871_v42 = vmul.f32 %v1148_v19, %v1462_v50  ;;  %v763_v48 = vadd.f32 %v762_v24, %v757_v33  ;;  %v868_v52 = vadd.f32 %v867_v35, %v861_v28  ;;  %v1126_v33 = vld [vmem:[%s1836_s2 + $0x28] sm:$0xff] }
  0xca   :  { %v653_v46 = vmax.f32 %v651_v32, 0.0  ;;  %v765_v49 = vadd.f32 %v764_v25, %v759_v34  ;;  %v770_v53 = vmul.f32 %v1135_v18, %v1535_v27  ;;  %v774_v55 = vmul.f32 %v1136_v31, %v1538_v29  ;;  %v1123_v18 = vld [vmem:[%s1836_s2 + $0x10] sm:$0xff]  ;;  %v1125_v32 = vld [vmem:[%s1836_s2 + $0x20] sm:$0xff] }
  0xcb   :  { %v776_v59 = vmul.f32 %v1136_v31, %v1553_v41  ;;  %v872_v51 = vadd.f32 %v871_v42, %v866_v40  ;;  %v873_v63 = vmul.f32 %v1148_v19, %v1484_v58  ;;  %v877_v0 = vmul.f32 %v1149_v36, %v1469_v54  ;;  %v1152_v19 = vld [vmem:[%s1835_s1 + $0xb0] sm:$0xff]  ;;  %v1124_v31 = vld [vmem:[%s1836_s2 + $0x18] sm:$0xff] }
  0xcc   :  { %v654_v60 = vadd.f32 %v653_v46, %v652_v37  ;;  %v879_v2 = vmul.f32 %v1149_v36, %v1488_v61  ;;  %v769_v13 = vadd.f32 %v768_v39, %v763_v48  ;;  %v771_v14 = vadd.f32 %v770_v53, %v765_v49  ;;  %v1127_v46 = vld [vmem:[%s1836_s2 + $0x30] sm:$0xff]  ;;  %v1163_v48 = vld [vmem:[%s1835_s1 + $0xc0] sm:$0xff]  ;;  %v1164_v49 = vld [vmem:[%s1835_s1 + $0xc8] sm:$0xff] }
  0xcd   :  { %v883_v16 = vmul.f32 %v1150_v43, %v1491_v62  ;;  %v885_v1 = vmul.f32 %v1150_v43, %v1499_v3  ;;  %v874_v24 = vadd.f32 %v873_v63, %v868_v52  ;;  %v878_v30 = vadd.f32 %v877_v0, %v872_v51 }
  0xce   :  { %v659_v20 = vrot.slane %v654_v60, %v1283_v4  ;;  %v667_v22 = vrot.slane %v654_v60, %v1286_v6  ;;  %v675_v23 = vrot.slane %v654_v60, %v1289_v7  ;;  %v683_v25 = vrot.slane %v654_v60, %v1292_v8 }
  0xcf   :  { %v691_v26 = vrot.slane %v654_v60, %v1436_v38  ;;  %v699_v28 = vrot.slane %v654_v60, %v1456_v47  ;;  %v889_v36 = vmul.f32 %v1151_v11, %v1509_v12  ;;  %v891_v37 = vmul.f32 %v1151_v11, %v1516_v17 }
  0xd0   :  { %v660_v34 = vmul.f32 %v659_v20, %v655_v5  ;;  %v668_v35 = vmul.f32 %v1122_v10, %v667_v22  ;;  %v676_v39 = vmul.f32 %v1123_v18, %v675_v23  ;;  %v707_v40 = vrot.slane %v654_v60, %v1475_v56  ;;  %v1153_v18 = vld [vmem:[%s1835_s1 + $0xb8] sm:$0xff] }
  0xd1   :  { %v715_v42 = vrot.slane %v654_v60, %v1505_v9  ;;  %v895_v43 = vmul.f32 %v1152_v19, %v1524_v21  ;;  %v775_v53 = vadd.f32 %v774_v55, %v769_v13  ;;  %v777_v51 = vadd.f32 %v776_v59, %v771_v14  ;;  %v1128_v60 = vld [vmem:[%s1836_s2 + $0x38] sm:$0xff] }
  0xd2   :  { %v669_v52 = vadd.f32 %v668_v35, %v660_v34  ;;  %v880_v63 = vadd.f32 %v879_v2, %v874_v24  ;;  %v684_v0 = vmul.f32 %v1124_v31, %v683_v25  ;;  %v692_v5 = vmul.f32 %v1125_v32, %v691_v26  ;;  %v1137_v25 = vld [vmem:[%s1836_s2 + $0x40] sm:$0xff] }
  0xd3   :  { %v700_v10 = vmul.f32 %v1126_v33, %v699_v28  ;;  %v884_v11 = vadd.f32 %v883_v16, %v878_v30  ;;  %v778_v22 = vmax.f32 %v775_v53, 0.0  ;;  %v779_v23 = vmax.f32 %v777_v51, 0.0  ;;  %v1165_v30 = vld [vmem:[%s1835_s1 + $0xd0] sm:$0xff]  ;;  %v1166_v51 = vld [vmem:[%s1835_s1 + $0xd8] sm:$0xff] }
  0xd4   :  { %v677_v20 = vadd.f32 %v676_v39, %v669_v52  ;;  %v886_v21 = vadd.f32 %v885_v1, %v880_v63  ;;  %v708_v34 = vmul.f32 %v1127_v46, %v707_v40  ;;  %v986_v59 = vmul.f32 %v1163_v48, %v1447_v44  ;;  %v1138_v1 = vld [vmem:[%s1836_s2 + $0x48] sm:$0xff]  ;;  %v1139_v33 = vld [vmem:[%s1836_s2 + $0x50] sm:$0xff]  ;;  %v1140_v39 = vld [vmem:[%s1836_s2 + $0x58] sm:$0xff] }
  0xd5   :  { %v890_v55 = vadd.f32 %v889_v36, %v884_v11  ;;  %v992_v2 = vmul.f32 %v1164_v49, %v1450_v45  ;;  %v716_v14 = vmul.f32 %v1128_v60, %v715_v42  ;;  %v1659_v24 = vadd.f32 %v779_v23, %v778_v22  ;;  %v1141_v52 = vld [vmem:[%s1836_s2 + $0x60] sm:$0xff] }
  0xd6   :  { %v685_v13 = vadd.f32 %v684_v0, %v677_v20  ;;  %v897_v16 = vmul.f32 %v1152_v19, %v1535_v27  ;;  %v892_v26 = vadd.f32 %v891_v37, %v886_v21  ;;  %v901_v28 = vmul.f32 %v1153_v18, %v1538_v29 }
  0xd7   :  { %v903_v44 = vmul.f32 %v1153_v18, %v1553_v41  ;;  %v988_v45 = vmul.f32 %v1163_v48, %v1478_v57  ;;  %v786_v31 = vrot.slane %v1659_v24, %v1283_v4  ;;  %v794_v32 = vrot.slane %v1659_v24, %v1286_v6 }
  0xd8   :  { %v693_v19 = vadd.f32 %v692_v5, %v685_v13  ;;  %v802_v21 = vrot.slane %v1659_v24, %v1289_v7  ;;  %v810_v57 = vrot.slane %v1659_v24, %v1292_v8  ;;  %v896_v35 = vadd.f32 %v895_v43, %v890_v55 }
  0xd9   :  { %v993_v36 = vadd.f32 %v992_v2, %v986_v59  ;;  %v994_v37 = vmul.f32 %v1164_v49, %v1481_v15  ;;  %v787_v42 = vmul.f32 %v1137_v25, %v786_v31  ;;  %v795_v46 = vmul.f32 %v1138_v1, %v794_v32  ;;  %v1167_v25 = vld [vmem:[%s1835_s1 + $0xe0] sm:$0xff]  ;;  %v1155_v32 = vld [vmem:[%s1836_s2 + $0x88] sm:$0xff] }
  0xda   :  { %v701_v40 = vadd.f32 %v700_v10, %v693_v19  ;;  %v818_v48 = vrot.slane %v1659_v24, %v1436_v38  ;;  %v826_v43 = vrot.slane %v1659_v24, %v1456_v47  ;;  %v834_v15 = vrot.slane %v1659_v24, %v1475_v56 }
  0xdb   :  { %v998_v49 = vmul.f32 %v1165_v30, %v1462_v50  ;;  %v1000_v53 = vmul.f32 %v1165_v30, %v1484_v58  ;;  %v796_v60 = vadd.f32 %v795_v46, %v787_v42  ;;  %v803_v0 = vmul.f32 %v1139_v33, %v802_v21  ;;  %v1142_v50 = vld [vmem:[%s1836_s2 + $0x68] sm:$0xff]  ;;  %v1143_v58 = vld [vmem:[%s1836_s2 + $0x70] sm:$0xff] }
  0xdc   :  { %v709_v63 = vadd.f32 %v708_v34, %v701_v40  ;;  %v898_v5 = vadd.f32 %v897_v16, %v892_v26  ;;  %v811_v10 = vmul.f32 %v1140_v39, %v810_v57  ;;  %v902_v11 = vadd.f32 %v901_v28, %v896_v35  ;;  %v1144_v16 = vld [vmem:[%s1836_s2 + $0x78] sm:$0xff]  ;;  %v1156_v46 = vld [vmem:[%s1836_s2 + $0x90] sm:$0xff] }
  0xdd   :  { %v995_v18 = vadd.f32 %v994_v37, %v988_v45  ;;  %v999_v20 = vadd.f32 %v998_v49, %v993_v36  ;;  %v804_v23 = vadd.f32 %v803_v0, %v796_v60  ;;  %v819_v55 = vmul.f32 %v1141_v52, %v818_v48  ;;  %v1168_v36 = vld [vmem:[%s1835_s1 + $0xe8] sm:$0xff]  ;;  %v1170_v0 = vld [vmem:[%s1835_s1 + $0xf8] sm:$0xff] }
  0xde   :  { %v1703_v22 = vadd.f32 %v716_v14, %v709_v63  ;;  %v904_v59 = vadd.f32 %v903_v44, %v898_v5  ;;  %v842_v34 = vrot.slane %v1659_v24, %v1505_v9  ;;  %v1004_v13 = vmul.f32 %v1166_v51, %v1469_v54 }
  0xdf   :  { %v1001_v2 = vadd.f32 %v1000_v53, %v995_v18  ;;  %v1006_v14 = vmul.f32 %v1166_v51, %v1488_v61  ;;  %v812_v26 = vadd.f32 %v811_v10, %v804_v23  ;;  %v905_v28 = vmax.f32 %v902_v11, 0.0  ;;  %v1154_v61 = vld [vmem:[%s1836_s2 + $0x80] sm:$0xff]  ;;  %v1157_v51 = vld [vmem:[%s1836_s2 + $0x98] sm:$0xff] }
  0xe0   :  { %v718_v1 = vand.u32 2147483647, %v1703_v22  ;;  %v906_v44 = vmax.f32 %v904_v59, 0.0  ;;  %v1005_v45 = vadd.f32 %v1004_v13, %v999_v20  ;;  %v827_v54 = vmul.f32 %v1142_v50, %v826_v43  ;;  %v1169_v43 = vld [vmem:[%s1835_s1 + $0xf0] sm:$0xff]  ;;  %v1158_v20 = vld [vmem:[%s1836_s2 + $0xa0] sm:$0xff]  ;;  %v1159_v13 = vld [vmem:[%s1836_s2 + $0xa8] sm:$0xff] }
  0xe1   :  { %v1007_v24 = vadd.f32 %v1006_v14, %v1001_v2  ;;  %v820_v19 = vadd.f32 %v819_v55, %v812_v26  ;;  %v835_v21 = vmul.f32 %v1143_v58, %v834_v15  ;;  %v843_v33 = vmul.f32 %v1144_v16, %v842_v34 }
  0xe2   :  { %v719_v30 = vsub.f32 0.0, %v718_v1  ;;  %v1722_v31 = vadd.f32 %v906_v44, %v905_v28  ;;  %v1010_v57 = vmul.f32 %v1167_v25, %v1491_v62  ;;  %v1012_v35 = vmul.f32 %v1167_v25, %v1499_v3 }
  0xe3   :  { %v828_v39 = vadd.f32 %v827_v54, %v820_v19  ;;  %v1016_v63 = vmul.f32 %v1168_v36, %v1509_v12  ;;  %v1018_v60 = vmul.f32 %v1168_v36, %v1516_v17  ;;  %v1840_v12 = vld [vmem:[#allocation2_spill] sm:$0xff]  ;;  %v1024_v17 = vmul.f32 %v1169_v43, %v1535_v27 }
  0xe4   :  { %v720_v37 = vmul.f32 1.442695, %v719_v30  ;;  %v913_v40 = vrot.slane %v1722_v31, %v1283_v4  ;;  %v921_v42 = vrot.slane %v1722_v31, %v1286_v6  ;;  %v929_v62 = vrot.slane %v1722_v31, %v1289_v7  ;;  %v1171_v36 = vld [vmem:[%s1836_s2 + $0xc0] sm:$0xff] }
  0xe5   :  { %v937_v3 = vrot.slane %v1722_v31, %v1292_v8  ;;  %v1011_v48 = vadd.f32 %v1010_v57, %v1005_v45  ;;  %v1013_v52 = vadd.f32 %v1012_v35, %v1007_v24  ;;  %v836_v15 = vadd.f32 %v835_v21, %v828_v39  ;;  %v1160_v45 = vld [vmem:[%s1836_s2 + $0xb0] sm:$0xff] }
  0xe6   :  { %1188 = vpow2.f32 %v720_v37  ;;  %v914_v49 = vmul.f32 %v1154_v61, %v913_v40  ;;  %v922_v53 = vmul.f32 %v1155_v32, %v921_v42  ;;  %v930_v11 = vmul.f32 %v1156_v46, %v929_v62  ;;  %v1172_v37 = vld [vmem:[%s1836_s2 + $0xc8] sm:$0xff] }
  0xe7   :  { %v1757_v5 = vadd.f32 %v843_v33, %v836_v15  ;;  %v945_v18 = vrot.slane %v1722_v31, %v1436_v38  ;;  %v1017_v23 = vadd.f32 %v1016_v63, %v1011_v48  ;;  %v1019_v55 = vadd.f32 %v1018_v60, %v1013_v52  ;;  %v1175_v63 = vld [vmem:[%s1836_s2 + $0xe0] sm:$0xff] }
  0xe8   :  { %v923_v10 = vadd.f32 %v922_v53, %v914_v49  ;;  %v1022_v59 = vmul.f32 %v1169_v43, %v1840_v12  ;;  %v938_v34 = vmul.f32 %v1157_v51, %v937_v3  ;;  %v953_v2 = vrot.slane %v1722_v31, %v1456_v47  ;;  %v1173_v3 = vld [vmem:[%s1836_s2 + $0xd0] sm:$0xff]  ;;  %v1174_v53 = vld [vmem:[%s1836_s2 + $0xd8] sm:$0xff] }
  0xe9   :  { %v845_v50 = vand.u32 2147483647, %v1757_v5  ;;  %v1025_v16 = vadd.f32 %v1024_v17, %v1019_v55  ;;  %v1028_v25 = vmul.f32 %v1170_v0, %v1538_v29  ;;  %v1030_v1 = vmul.f32 %v1170_v0, %v1553_v41  ;;  %v1161_v41 = vld [vmem:[%s1836_s2 + $0xb8] sm:$0xff] }
  0xea   :  { %v931_v58 = vadd.f32 %v930_v11, %v923_v10  ;;  %v1023_v14 = vadd.f32 %v1022_v59, %v1017_v23  ;;  %v946_v27 = vmul.f32 %v1158_v20, %v945_v18  ;;  %v961_v44 = vrot.slane %v1722_v31, %v1475_v56 }
  0xeb   :  { %v846_v26 = vsub.f32 0.0, %v845_v50  ;;  %v1031_v30 = vadd.f32 %v1030_v1, %v1025_v16  ;;  %v954_v61 = vmul.f32 %v1159_v13, %v953_v2  ;;  %v969_v29 = vrot.slane %v1722_v31, %v1505_v9 }
  0xec   :  { %v939_v28 = vadd.f32 %v938_v34, %v931_v58  ;;  %v1029_v24 = vadd.f32 %v1028_v25, %v1023_v14  ;;  %v962_v57 = vmul.f32 %v1160_v45, %v961_v44  ;;  %vm722_vm13 = vcmp.ge.f32.partialorder %v1703_v22, 0.0 }
  0xed   :  { %v847_v19 = vmul.f32 1.442695, %v846_v26  ;;  %v1033_v21 = vmax.f32 %v1031_v30, 0.0  ;;  %v970_v31 = vmul.f32 %v1161_v41, %v969_v29  ;;  %vm849_vm14 = vcmp.ge.f32.partialorder %v1757_v5, 0.0 }
  0xee   :  { %v947_v54 = vadd.f32 %v946_v27, %v939_v28  ;;  %v1032_v32 = vmax.f32 %v1029_v24, 0.0 }
  0xef   :  { %1190 = vpow2.f32 %v847_v19 }
  0xf0   :  { %v955_v33 = vadd.f32 %v954_v61, %v947_v54  ;;  %v1034_v35 = vadd.f32 %v1033_v21, %v1032_v32 }
  0xf2   :  { %v963_v39 = vadd.f32 %v962_v57, %v955_v33  ;;  %v1040_v42 = vrot.slane %v1034_v35, %v1283_v4  ;;  %v1048_v46 = vrot.slane %v1034_v35, %v1286_v6  ;;  %v1056_v62 = vrot.slane %v1034_v35, %v1289_v7 }
  0xf3   :  { %v1189_v40 = vpop.eup %1188  ;;  %v1064_v49 = vrot.slane %v1034_v35, %v1292_v8  ;;  %v1072_v7 = vrot.slane %v1034_v35, %v1436_v38  ;;  %v1080_v11 = vrot.slane %v1034_v35, %v1456_v47  ;;  %v1176_v8 = vld [vmem:[%s1836_s2 + $0xe8] sm:$0xff]  ;;  %v1088_v55 = vrot.slane %v1034_v35, %v1475_v56  ;;  %v1177_v38 = vld [vmem:[%s1836_s2 + $0xf0] sm:$0xff]  ;;  %v1178_v47 = vld [vmem:[%s1836_s2 + $0xf8] sm:$0xff] }
  0xf4   :  { %v723_v48 = vadd.f32 1.0, %v1189_v40  ;;  %v971_v52 = vadd.f32 %v970_v31, %v963_v39  ;;  %v1041_v43 = vmul.f32 %v1171_v36, %v1040_v42  ;;  %v1049_v15 = vmul.f32 %v1172_v37, %v1048_v46 }
  0xf5   :  { %v1057_v6 = vmul.f32 %v1173_v3, %v1056_v62  ;;  %v1065_v10 = vmul.f32 %v1174_v53, %v1064_v49  ;;  %v1073_v23 = vmul.f32 %v1175_v63, %v1072_v7  ;;  %v1081_v17 = vmul.f32 %v1176_v8, %v1080_v11 }
  0xf6   :  { %1192 = vrcp.f32 %v723_v48  ;;  %v972_v4 = vand.u32 2147483647, %v971_v52  ;;  %v1050_v51 = vadd.f32 %v1049_v15, %v1041_v43  ;;  %v1096_v50 = vrot.slane %v1034_v35, %v1505_v9 }
  0xf7   :  { %v1089_v2 = vmul.f32 %v1177_v38, %v1088_v55  ;;  %vm976_vm15 = vcmp.ge.f32.partialorder %v971_v52, 0.0 }
  0xf8   :  { %v973_v60 = vsub.f32 0.0, %v972_v4  ;;  %v1058_v0 = vadd.f32 %v1057_v6, %v1050_v51  ;;  %v1097_v56 = vmul.f32 %v1178_v47, %v1096_v50 }
  0xfa   :  { %v974_v18 = vmul.f32 1.442695, %v973_v60  ;;  %v1066_v20 = vadd.f32 %v1065_v10, %v1058_v0 }
  0xfc   :  { %1194 = vpow2.f32 %v974_v18  ;;  %v1191_v12 = vpop.eup %1190  ;;  %v1074_v59 = vadd.f32 %v1073_v23, %v1066_v20 }
  0xfd   :  { %v850_v58 = vadd.f32 1.0, %v1191_v12 }
  0xfe   :  { %v1082_v34 = vadd.f32 %v1081_v17, %v1074_v59 }
  0xff   :  { %1196 = vrcp.f32 %v850_v58 }
 0x100   :  { %v1090_v13 = vadd.f32 %v1089_v2, %v1082_v34 }
 0x102   :  { %v1098_v16 = vadd.f32 %v1097_v56, %v1090_v13 }
 0x103   :  { %v1193_v14 = vpop.eup %1192 }
 0x104   :  { %v726_v25 = vmul.f32 %v1193_v14, %v1189_v40  ;;  %v1099_v1 = vand.u32 2147483647, %v1098_v16  ;;  %vm1103_vm0 = vcmp.ge.f32.partialorder %v1098_v16, 0.0 }
 0x106   :  { %v727_v26 = vsel %vm722_vm13, %v1193_v14, %v726_v25  ;;  %v1100_v9 = vsub.f32 0.0, %v1099_v1 }
 0x107   :  { %729 = vst.msk [vmem:[%s1837_s3] sm:$0xff] %vm728_vm12, %v727_v26 }
 0x108   :  { %v1101_v27 = vmul.f32 1.442695, %v1100_v9 }
 0x109   :  { %v1195_v28 = vpop.eup %1194 }
 0x10a   :  { %v977_v44 = vadd.f32 1.0, %v1195_v28  ;;  %1198 = vpow2.f32 %v1101_v27 }
 0x10c   :  { %1200 = vrcp.f32 %v977_v44  ;;  %v1197_v45 = vpop.eup %1196 }
 0x10d   :  { %v853_v24 = vmul.f32 %v1197_v45, %v1191_v12 }
 0x10f   :  { %v854_v30 = vsel %vm849_vm14, %v1197_v45, %v853_v24 }
 0x110   :  { %1145 = vst.msk [vmem:[%s1837_s3 + $0x8] sm:$0xff] %vm728_vm12, %v854_v30 }
 0x117   :  { %v1199_v22 = vpop.eup %1198 }
 0x118   :  { %v1104_v54 = vadd.f32 1.0, %v1199_v22 }
 0x119   :  { %v1201_v19 = vpop.eup %1200 }
 0x11a   :  { %v980_v61 = vmul.f32 %v1201_v19, %v1195_v28  ;;  %1202 = vrcp.f32 %v1104_v54 }
 0x11c   :  { %v981_v29 = vsel %vm976_vm15, %v1201_v19, %v980_v61 }
 0x11d   :  { %1162 = vst.msk [vmem:[%s1837_s3 + $0x10] sm:$0xff] %vm728_vm12, %v981_v29 }
 0x127   :  { %v1203_v41 = vpop.eup %1202 }
 0x128   :  { %v1107_v5 = vmul.f32 %v1203_v41, %v1199_v22 }
 0x12a   :  { %v1108_v32 = vsel %vm1103_vm0, %v1203_v41, %v1107_v5 }
 0x12b   :  { %1179 = vst.msk [vmem:[%s1837_s3 + $0x18] sm:$0xff] %vm728_vm12, %v1108_v32 }

</bundles_post_ra>
